<compile_context>
chip_gen: v7x
topology: tpu7x:2x2x1
jax: 0.10.0
libtpu: 0.0.40
codegen_flags: <defaults>
</compile_context>

<pallas_src>
import functools

import jax
import jax.numpy as jnp
from jax.experimental import pallas as pl
from jax.experimental.pallas import tpu as pltpu


# ----------------------------- fused Pallas kernel -----------------------------

def _pa_msa_kernel(x_ref, t_ref, wqkv_ref, bqkv_ref, wqt_ref, bqt_ref,
                   wd_ref, bd_ref, mask_ref, wqc_ref, bqc_ref, temp_ref,
                   o_ref, *, H, W, C):
    HW = H * W
    x = x_ref[...].astype(jnp.float32)                      # (C, HW)
    t = t_ref[...].astype(jnp.float32)                      # (C, HW)

    # ---- all four 1x1 convs as two lane-dense MXU matmuls ----------------------------
    # rows of qkv: [q (0:C), k (C:2C), v (2C:3C)]
    qkv = jnp.dot(wqkv_ref[...], x, preferred_element_type=jnp.float32) + bqkv_ref[...]
    qt0 = jnp.dot(wqt_ref[...], t, preferred_element_type=jnp.float32) + bqt_ref[...]

    # ---- fused depthwise 3x3 conv (stride 1, zero padding 1) over all 4 branches -----
    z = jnp.concatenate([qkv, qt0], axis=0)                 # (4C, HW): [q, k, v, q_T]
    wd = wd_ref[...].astype(jnp.float32)                    # (9, 4C, 1), loaded once
    m9 = mask_ref[...]                                      # (9, 1, HW) padding masks
    acc = jnp.zeros_like(z)
    for ky in range(3):
        for kx in range(3):
            k_idx = ky * 3 + kx
            d = (ky - 1) * W + (kx - 1)                     # flat offset of tap (ky, kx)
            if d == 0:
                tap = z
            else:
                # shifted[n] == z[n + d]; wrap-around positions are zeroed by the mask.
                tap = pltpu.roll(z, shift=(-d) % HW, axis=1) * m9[k_idx]
            acc = acc + tap * wd[k_idx]
    acc = acc + bd_ref[...]                                 # (4C, HW)

    q = acc[0 * C:1 * C]
    k = acc[1 * C:2 * C]
    v = acc[2 * C:3 * C]
    q_t = acc[3 * C:4 * C]

    # ---- q_concat: 1x1 conv over the concatenated 2*num_heads channel axis -----------
    q_mix = (jnp.dot(wqc_ref[...], jnp.concatenate([q, q_t], axis=0),
                     preferred_element_type=jnp.float32) + bqc_ref[...])   # (C, HW)

    # ---- attention: num_heads == dim  =>  c_head == 1, per-head attn matrix is 1x1 ---
    eps = 1e-12                                             # F.normalize default
    qn = q_mix / jnp.maximum(jnp.sqrt(jnp.sum(q_mix * q_mix, axis=-1, keepdims=True)), eps)
    kn = k / jnp.maximum(jnp.sqrt(jnp.sum(k * k, axis=-1, keepdims=True)), eps)
    logits = jnp.sum(qn * kn, axis=-1, keepdims=True) * temp_ref[...]      # (C, 1)
    # stable softmax over each head's key axis (length c_head == 1)
    logits = logits - jnp.max(logits, axis=-1, keepdims=True)
    p = jnp.exp(logits)
    p = p / jnp.sum(p, axis=-1, keepdims=True)              # == 1 exactly (length-1 axis)
    o_ref[...] = (p * v).astype(o_ref.dtype)


# ----------------------------- forward (weight packing + one pallas_call) -----------------------------

def pa_msa_forward(x, t, params, num_heads):
    """x, t: (B, C, H, W) float32 (PyTorch NCHW convention).  Returns (B, C, H, W)."""
    b, c, h, w = x.shape
    assert c % num_heads == 0
    c_head = c // num_heads
    # q_concat is Conv2d(2*dim, dim, 1) applied to a 2*num_heads-channel tensor, so the
    # PyTorch module only runs when num_heads == dim, i.e. c_head == 1.
    assert c_head == 1, "PA_MSA requires num_heads == dim (q_concat channel constraint)"
    hw = h * w
    f32 = jnp.float32

    x3 = x.reshape(b, c, hw)          # NCHW -> (B, C, H*W): contiguous reshape, no transpose
    t3 = t.reshape(b, c, hw)

    # pack the 1x1 conv weights: q/k/v share the x input -> one (3C, C) matmul
    w_qkv = jnp.concatenate([params["q_w"][:, :, 0, 0],
                             params["k_w"][:, :, 0, 0],
                             params["v_w"][:, :, 0, 0]], axis=0).astype(f32)        # (3C, C)
    b_qkv = jnp.concatenate([params["q_b"], params["k_b"],
                             params["v_b"]]).reshape(3 * c, 1).astype(f32)
    w_qt = params["qT_w"][:, :, 0, 0].astype(f32)                                    # (C, C)
    b_qt = params["qT_b"].reshape(c, 1).astype(f32)

    # depthwise 3x3 weights for all 4 branches, laid out per tap: (9, 4C, 1)
    wd_all = jnp.concatenate([params["qd_w"][:, 0].reshape(c, 9),
                              params["kd_w"][:, 0].reshape(c, 9),
                              params["vd_w"][:, 0].reshape(c, 9),
                              params["qTd_w"][:, 0].reshape(c, 9)], axis=0).astype(f32)
    wd_taps = jnp.transpose(wd_all, (1, 0)).reshape(9, 4 * c, 1)
    bd_all = jnp.concatenate([params["qd_b"], params["kd_b"], params["vd_b"],
                              params["qTd_b"]]).reshape(4 * c, 1).astype(f32)

    w_qc = params["qc_w"][:, :, 0, 0].astype(f32)                                    # (C, 2C)
    b_qc = params["qc_b"].reshape(c, 1).astype(f32)
    temp = params["temperature"].reshape(num_heads, 1).astype(f32)                   # (C, 1)

    # per-tap zero-padding masks for the depthwise conv (depend only on H, W)
    rows = jnp.arange(hw, dtype=jnp.int32) // w
    cols = jnp.arange(hw, dtype=jnp.int32) % w
    masks = []
    for ky in range(3):
        for kx in range(3):
            dy, dx = ky - 1, kx - 1
            ok = ((rows + dy >= 0) & (rows + dy < h) &
                  (cols + dx >= 0) & (cols + dx < w))
            masks.append(ok.astype(f32))
    dw_mask = jnp.stack(masks, axis=0).reshape(9, 1, hw)

    kernel = functools.partial(_pa_msa_kernel, H=h, W=w, C=c)
    per_img = pl.BlockSpec((None, c, hw), lambda i: (i, 0, 0))
    rep2 = lambda i: (0, 0)
    rep3 = lambda i: (0, 0, 0)

    out3 = pl.pallas_call(
        kernel,
        out_shape=jax.ShapeDtypeStruct((b, c, hw), x.dtype),
        grid=(b,),
        in_specs=[
            per_img,                                        # x image  (C, HW)
            pl.BlockSpec((None, c, hw), lambda i: (i, 0, 0)),   # t image
            pl.BlockSpec((3 * c, c), rep2),                 # fused q/k/v 1x1 weights
            pl.BlockSpec((3 * c, 1), rep2),
            pl.BlockSpec((c, c), rep2),                     # q_T 1x1 weights
            pl.BlockSpec((c, 1), rep2),
            pl.BlockSpec((9, 4 * c, 1), rep3),              # depthwise taps
            pl.BlockSpec((4 * c, 1), rep2),
            pl.BlockSpec((9, 1, hw), rep3),                 # padding masks
            pl.BlockSpec((c, 2 * c), rep2),                 # q_concat weights
            pl.BlockSpec((c, 1), rep2),
            pl.BlockSpec((c, 1), rep2),                     # temperature
        ],
        out_specs=pl.BlockSpec((None, c, hw), lambda i: (i, 0, 0)),
        compiler_params=pltpu.CompilerParams(
            dimension_semantics=("parallel",)),             # batch axis -> both TCs on v7x
    )(x3, t3, w_qkv, b_qkv, w_qt, b_qt, wd_taps, bd_all, dw_mask, w_qc, b_qc, temp)
    return out3.reshape(b, c, h, w)


# ----------------------------- pure-JAX reference (for checking) -----------------------------

def _ref_conv1x1(x, w, b):
    y = jax.lax.conv_general_dilated(
        x, w, window_strides=(1, 1), padding="VALID",
        dimension_numbers=("NCHW", "OIHW", "NCHW"))
    return y + b[None, :, None, None]


def _ref_dwconv3x3(x, w, b):
    y = jax.lax.conv_general_dilated(
        x, w, window_strides=(1, 1), padding=((1, 1), (1, 1)),
        dimension_numbers=("NCHW", "OIHW", "NCHW"),
        feature_group_count=x.shape[1])
    return y + b[None, :, None, None]


def pa_msa_reference(x, t, params, num_heads):
    b, c, h, w = x.shape
    c_head = c // num_heads
    q = _ref_dwconv3x3(_ref_conv1x1(x, params["q_w"], params["q_b"]),
                       params["qd_w"], params["qd_b"])
    q_t = _ref_dwconv3x3(_ref_conv1x1(t, params["qT_w"], params["qT_b"]),
                         params["qTd_w"], params["qTd_b"])
    k = _ref_dwconv3x3(_ref_conv1x1(x, params["k_w"], params["k_b"]),
                       params["kd_w"], params["kd_b"])
    v = _ref_dwconv3x3(_ref_conv1x1(x, params["v_w"], params["v_b"]),
                       params["vd_w"], params["vd_b"])

    def rearr(a):
        return a.reshape(b, num_heads, c_head, h * w)

    q, q_t, k, v = rearr(q), rearr(q_t), rearr(k), rearr(v)
    q_cat = jnp.concatenate([q, q_t], axis=1)
    q = (jnp.einsum("oc,bcij->boij", params["qc_w"][:, :, 0, 0], q_cat)
         + params["qc_b"][None, :, None, None])

    def l2n(a):
        return a / jnp.maximum(jnp.sqrt(jnp.sum(a * a, axis=-1, keepdims=True)), 1e-12)

    q = l2n(q)
    k = l2n(k)
    attn = jnp.einsum("bhcn,bhdn->bhcd", q, k) * params["temperature"][None]
    attn = jax.nn.softmax(attn, axis=-1)
    out = jnp.einsum("bhcd,bhdn->bhcn", attn, v)
    return out.reshape(b, c, h, w)


# ----------------------------- main -----------------------------

if __name__ == "__main__":
    key = jax.random.PRNGKey(0)
    dim = 8
    num_heads = 8       # module requires num_heads == dim (see note in pa_msa_forward)
    batch, height, width = 2, 16, 16

    ks = jax.random.split(key, 24)

    def init(k, shape, scale=0.1):
        return scale * jax.random.normal(k, shape, dtype=jnp.float32)

    params = {
        "temperature": 1.0 + 0.1 * jax.random.normal(ks[0], (num_heads, 1, 1), dtype=jnp.float32),
        "q_w":  init(ks[1], (dim, dim, 1, 1)),     "q_b":  init(ks[2], (dim,)),
        "qd_w": init(ks[3], (dim, 1, 3, 3)),       "qd_b": init(ks[4], (dim,)),
        "qT_w": init(ks[5], (dim, dim, 1, 1)),     "qT_b": init(ks[6], (dim,)),
        "qTd_w": init(ks[7], (dim, 1, 3, 3)),      "qTd_b": init(ks[8], (dim,)),
        "qc_w": init(ks[9], (dim, 2 * dim, 1, 1)), "qc_b": init(ks[10], (dim,)),
        "k_w":  init(ks[11], (dim, dim, 1, 1)),    "k_b":  init(ks[12], (dim,)),
        "kd_w": init(ks[13], (dim, 1, 3, 3)),      "kd_b": init(ks[14], (dim,)),
        "v_w":  init(ks[15], (dim, dim, 1, 1)),    "v_b":  init(ks[16], (dim,)),
        "vd_w": init(ks[17], (dim, 1, 3, 3)),      "vd_b": init(ks[18], (dim,)),
    }

    x = jax.random.normal(ks[19], (batch, dim, height, width), dtype=jnp.float32)
    t = jax.random.normal(ks[20], (batch, dim, height, width), dtype=jnp.float32)

    fwd = jax.jit(functools.partial(pa_msa_forward, num_heads=num_heads))
    out = fwd(x, t, params)
    out = jax.block_until_ready(out)
    assert out.shape == (batch, dim, height, width)

    ref = pa_msa_reference(x, t, params, num_heads)
    max_err = float(jnp.max(jnp.abs(out - ref)))
    assert max_err < 1e-4, f"max abs error {max_err}"
    print("KERNEL_OK")
</pallas_src>

<mosaic_0001>
module attributes {stable_mosaic.version = 11 : i64} {
  func.func @_pa_msa_kernel(%arg0: i32, %arg1: memref<1x8x256xf32, #tpu.memory_space<vmem>>, %arg2: memref<1x8x256xf32, #tpu.memory_space<vmem>>, %arg3: memref<24x8xf32, #tpu.memory_space<vmem>>, %arg4: memref<24x1xf32, #tpu.memory_space<vmem>>, %arg5: memref<8x8xf32, #tpu.memory_space<vmem>>, %arg6: memref<8x1xf32, #tpu.memory_space<vmem>>, %arg7: memref<9x32x1xf32, #tpu.memory_space<vmem>>, %arg8: memref<32x1xf32, #tpu.memory_space<vmem>>, %arg9: memref<9x1x256xf32, #tpu.memory_space<vmem>>, %arg10: memref<8x16xf32, #tpu.memory_space<vmem>>, %arg11: memref<8x1xf32, #tpu.memory_space<vmem>>, %arg12: memref<8x1xf32, #tpu.memory_space<vmem>>, %arg13: memref<1x8x256xf32, #tpu.memory_space<vmem>>) attributes {dimension_semantics = [#tpu.dimension_semantics<parallel>], iteration_bounds = array<i64: 2>, scalar_prefetch = 0 : i64, scratch_operands = 0 : i64, tpu.core_type = #tpu.core_type<tc>, window_params = [{transform_indices = @transform_0, window_bounds = array<i64: 1, 8, 256>}, {transform_indices = @transform_1, window_bounds = array<i64: 1, 8, 256>}, {pipeline_mode = #tpu.pipeline_mode<synchronous>, transform_indices = @transform_2, window_bounds = array<i64: 24, 8>}, {pipeline_mode = #tpu.pipeline_mode<synchronous>, transform_indices = @transform_3, window_bounds = array<i64: 24, 1>}, {pipeline_mode = #tpu.pipeline_mode<synchronous>, transform_indices = @transform_4, window_bounds = array<i64: 8, 8>}, {pipeline_mode = #tpu.pipeline_mode<synchronous>, transform_indices = @transform_5, window_bounds = array<i64: 8, 1>}, {pipeline_mode = #tpu.pipeline_mode<synchronous>, transform_indices = @transform_6, window_bounds = array<i64: 9, 32, 1>}, {pipeline_mode = #tpu.pipeline_mode<synchronous>, transform_indices = @transform_7, window_bounds = array<i64: 32, 1>}, {pipeline_mode = #tpu.pipeline_mode<synchronous>, transform_indices = @transform_8, window_bounds = array<i64: 9, 1, 256>}, {pipeline_mode = #tpu.pipeline_mode<synchronous>, transform_indices = @transform_9, window_bounds = array<i64: 8, 16>}, {pipeline_mode = #tpu.pipeline_mode<synchronous>, transform_indices = @transform_10, window_bounds = array<i64: 8, 1>}, {pipeline_mode = #tpu.pipeline_mode<synchronous>, transform_indices = @transform_11, window_bounds = array<i64: 8, 1>}, {transform_indices = @transform_12, window_bounds = array<i64: 1, 8, 256>}]} {
    %c0 = arith.constant 0 : index
    %c0_0 = arith.constant 0 : index
    %c0_1 = arith.constant 0 : index
    %0 = vector.load %arg1[%c0, %c0_0, %c0_1] : memref<1x8x256xf32, #tpu.memory_space<vmem>>, vector<1x8x256xf32>
    %1 = vector.shape_cast %0 : vector<1x8x256xf32> to vector<8x256xf32>
    %c0_2 = arith.constant 0 : index
    %c0_3 = arith.constant 0 : index
    %c0_4 = arith.constant 0 : index
    %2 = vector.load %arg2[%c0_2, %c0_3, %c0_4] : memref<1x8x256xf32, #tpu.memory_space<vmem>>, vector<1x8x256xf32>
    %3 = vector.shape_cast %2 : vector<1x8x256xf32> to vector<8x256xf32>
    %c0_5 = arith.constant 0 : index
    %c0_6 = arith.constant 0 : index
    %4 = vector.load %arg3[%c0_5, %c0_6] : memref<24x8xf32, #tpu.memory_space<vmem>>, vector<24x8xf32>
    %cst = arith.constant dense<0.000000e+00> : vector<24x256xf32>
    %5 = tpu.matmul %4, %1, %cst {dimension_numbers = #tpu.dot_dimension_numbers<[1], [0], [0], [1], [0, 0, 1, 1], [], []>} : vector<24x8xf32>, vector<8x256xf32>, vector<24x256xf32> -> vector<24x256xf32>
    %c0_7 = arith.constant 0 : index
    %c0_8 = arith.constant 0 : index
    %6 = vector.load %arg4[%c0_7, %c0_8] : memref<24x1xf32, #tpu.memory_space<vmem>>, vector<24x1xf32>
    %7 = vector.broadcast %6 : vector<24x1xf32> to vector<24x256xf32>
    %8 = arith.addf %5, %7 : vector<24x256xf32>
    %c0_9 = arith.constant 0 : index
    %c0_10 = arith.constant 0 : index
    %9 = vector.load %arg5[%c0_9, %c0_10] : memref<8x8xf32, #tpu.memory_space<vmem>>, vector<8x8xf32>
    %cst_11 = arith.constant dense<0.000000e+00> : vector<8x256xf32>
    %10 = tpu.matmul %9, %3, %cst_11 {dimension_numbers = #tpu.dot_dimension_numbers<[1], [0], [0], [1], [0, 0, 1, 1], [], []>} : vector<8x8xf32>, vector<8x256xf32>, vector<8x256xf32> -> vector<8x256xf32>
    %c0_12 = arith.constant 0 : index
    %c0_13 = arith.constant 0 : index
    %11 = vector.load %arg6[%c0_12, %c0_13] : memref<8x1xf32, #tpu.memory_space<vmem>>, vector<8x1xf32>
    %12 = vector.broadcast %11 : vector<8x1xf32> to vector<8x256xf32>
    %13 = arith.addf %10, %12 : vector<8x256xf32>
    %14 = tpu.concatenate %8, %13 in 0 : vector<24x256xf32>, vector<8x256xf32> -> vector<32x256xf32>
    %c0_14 = arith.constant 0 : index
    %c0_15 = arith.constant 0 : index
    %c0_16 = arith.constant 0 : index
    %15 = vector.load %arg7[%c0_14, %c0_15, %c0_16] : memref<9x32x1xf32, #tpu.memory_space<vmem>>, vector<9x32x1xf32>
    %c0_17 = arith.constant 0 : index
    %c0_18 = arith.constant 0 : index
    %c0_19 = arith.constant 0 : index
    %16 = vector.load %arg9[%c0_17, %c0_18, %c0_19] : memref<9x1x256xf32, #tpu.memory_space<vmem>>, vector<9x1x256xf32>
    %cst_20 = arith.constant 0.000000e+00 : f32
    %17 = vector.broadcast %cst_20 : f32 to vector<32x256xf32>
    %c17_i32 = arith.constant 17 : i32
    %18 = tpu.dynamic_rotate %14 by %c17_i32 dim 1 : vector<32x256xf32>, i32 -> vector<32x256xf32>
    %19 = vector.extract_strided_slice %16 {offsets = [0, 0, 0], sizes = [1, 1, 256], strides = [1, 1, 1]} : vector<9x1x256xf32> to vector<1x1x256xf32>
    %20 = vector.shape_cast %19 : vector<1x1x256xf32> to vector<1x256xf32>
    %21 = vector.broadcast %20 : vector<1x256xf32> to vector<32x256xf32>
    %22 = arith.mulf %18, %21 : vector<32x256xf32>
    %23 = vector.extract_strided_slice %15 {offsets = [0, 0, 0], sizes = [1, 32, 1], strides = [1, 1, 1]} : vector<9x32x1xf32> to vector<1x32x1xf32>
    %24 = vector.shape_cast %23 : vector<1x32x1xf32> to vector<32x1xf32>
    %25 = vector.broadcast %24 : vector<32x1xf32> to vector<32x256xf32>
    %26 = arith.mulf %22, %25 : vector<32x256xf32>
    %27 = arith.addf %17, %26 : vector<32x256xf32>
    %c16_i32 = arith.constant 16 : i32
    %28 = tpu.dynamic_rotate %14 by %c16_i32 dim 1 : vector<32x256xf32>, i32 -> vector<32x256xf32>
    %29 = vector.extract_strided_slice %16 {offsets = [1, 0, 0], sizes = [1, 1, 256], strides = [1, 1, 1]} : vector<9x1x256xf32> to vector<1x1x256xf32>
    %30 = vector.shape_cast %29 : vector<1x1x256xf32> to vector<1x256xf32>
    %31 = vector.broadcast %30 : vector<1x256xf32> to vector<32x256xf32>
    %32 = arith.mulf %28, %31 : vector<32x256xf32>
    %33 = vector.extract_strided_slice %15 {offsets = [1, 0, 0], sizes = [1, 32, 1], strides = [1, 1, 1]} : vector<9x32x1xf32> to vector<1x32x1xf32>
    %34 = vector.shape_cast %33 : vector<1x32x1xf32> to vector<32x1xf32>
    %35 = vector.broadcast %34 : vector<32x1xf32> to vector<32x256xf32>
    %36 = arith.mulf %32, %35 : vector<32x256xf32>
    %37 = arith.addf %27, %36 : vector<32x256xf32>
    %c15_i32 = arith.constant 15 : i32
    %38 = tpu.dynamic_rotate %14 by %c15_i32 dim 1 : vector<32x256xf32>, i32 -> vector<32x256xf32>
    %39 = vector.extract_strided_slice %16 {offsets = [2, 0, 0], sizes = [1, 1, 256], strides = [1, 1, 1]} : vector<9x1x256xf32> to vector<1x1x256xf32>
    %40 = vector.shape_cast %39 : vector<1x1x256xf32> to vector<1x256xf32>
    %41 = vector.broadcast %40 : vector<1x256xf32> to vector<32x256xf32>
    %42 = arith.mulf %38, %41 : vector<32x256xf32>
    %43 = vector.extract_strided_slice %15 {offsets = [2, 0, 0], sizes = [1, 32, 1], strides = [1, 1, 1]} : vector<9x32x1xf32> to vector<1x32x1xf32>
    %44 = vector.shape_cast %43 : vector<1x32x1xf32> to vector<32x1xf32>
    %45 = vector.broadcast %44 : vector<32x1xf32> to vector<32x256xf32>
    %46 = arith.mulf %42, %45 : vector<32x256xf32>
    %47 = arith.addf %37, %46 : vector<32x256xf32>
    %c1_i32 = arith.constant 1 : i32
    %48 = tpu.dynamic_rotate %14 by %c1_i32 dim 1 : vector<32x256xf32>, i32 -> vector<32x256xf32>
    %49 = vector.extract_strided_slice %16 {offsets = [3, 0, 0], sizes = [1, 1, 256], strides = [1, 1, 1]} : vector<9x1x256xf32> to vector<1x1x256xf32>
    %50 = vector.shape_cast %49 : vector<1x1x256xf32> to vector<1x256xf32>
    %51 = vector.broadcast %50 : vector<1x256xf32> to vector<32x256xf32>
    %52 = arith.mulf %48, %51 : vector<32x256xf32>
    %53 = vector.extract_strided_slice %15 {offsets = [3, 0, 0], sizes = [1, 32, 1], strides = [1, 1, 1]} : vector<9x32x1xf32> to vector<1x32x1xf32>
    %54 = vector.shape_cast %53 : vector<1x32x1xf32> to vector<32x1xf32>
    %55 = vector.broadcast %54 : vector<32x1xf32> to vector<32x256xf32>
    %56 = arith.mulf %52, %55 : vector<32x256xf32>
    %57 = arith.addf %47, %56 : vector<32x256xf32>
    %58 = vector.extract_strided_slice %15 {offsets = [4, 0, 0], sizes = [1, 32, 1], strides = [1, 1, 1]} : vector<9x32x1xf32> to vector<1x32x1xf32>
    %59 = vector.shape_cast %58 : vector<1x32x1xf32> to vector<32x1xf32>
    %60 = vector.broadcast %59 : vector<32x1xf32> to vector<32x256xf32>
    %61 = arith.mulf %14, %60 : vector<32x256xf32>
    %62 = arith.addf %57, %61 : vector<32x256xf32>
    %c255_i32 = arith.constant 255 : i32
    %63 = tpu.dynamic_rotate %14 by %c255_i32 dim 1 : vector<32x256xf32>, i32 -> vector<32x256xf32>
    %64 = vector.extract_strided_slice %16 {offsets = [5, 0, 0], sizes = [1, 1, 256], strides = [1, 1, 1]} : vector<9x1x256xf32> to vector<1x1x256xf32>
    %65 = vector.shape_cast %64 : vector<1x1x256xf32> to vector<1x256xf32>
    %66 = vector.broadcast %65 : vector<1x256xf32> to vector<32x256xf32>
    %67 = arith.mulf %63, %66 : vector<32x256xf32>
    %68 = vector.extract_strided_slice %15 {offsets = [5, 0, 0], sizes = [1, 32, 1], strides = [1, 1, 1]} : vector<9x32x1xf32> to vector<1x32x1xf32>
    %69 = vector.shape_cast %68 : vector<1x32x1xf32> to vector<32x1xf32>
    %70 = vector.broadcast %69 : vector<32x1xf32> to vector<32x256xf32>
    %71 = arith.mulf %67, %70 : vector<32x256xf32>
    %72 = arith.addf %62, %71 : vector<32x256xf32>
    %c241_i32 = arith.constant 241 : i32
    %73 = tpu.dynamic_rotate %14 by %c241_i32 dim 1 : vector<32x256xf32>, i32 -> vector<32x256xf32>
    %74 = vector.extract_strided_slice %16 {offsets = [6, 0, 0], sizes = [1, 1, 256], strides = [1, 1, 1]} : vector<9x1x256xf32> to vector<1x1x256xf32>
    %75 = vector.shape_cast %74 : vector<1x1x256xf32> to vector<1x256xf32>
    %76 = vector.broadcast %75 : vector<1x256xf32> to vector<32x256xf32>
    %77 = arith.mulf %73, %76 : vector<32x256xf32>
    %78 = vector.extract_strided_slice %15 {offsets = [6, 0, 0], sizes = [1, 32, 1], strides = [1, 1, 1]} : vector<9x32x1xf32> to vector<1x32x1xf32>
    %79 = vector.shape_cast %78 : vector<1x32x1xf32> to vector<32x1xf32>
    %80 = vector.broadcast %79 : vector<32x1xf32> to vector<32x256xf32>
    %81 = arith.mulf %77, %80 : vector<32x256xf32>
    %82 = arith.addf %72, %81 : vector<32x256xf32>
    %c240_i32 = arith.constant 240 : i32
    %83 = tpu.dynamic_rotate %14 by %c240_i32 dim 1 : vector<32x256xf32>, i32 -> vector<32x256xf32>
    %84 = vector.extract_strided_slice %16 {offsets = [7, 0, 0], sizes = [1, 1, 256], strides = [1, 1, 1]} : vector<9x1x256xf32> to vector<1x1x256xf32>
    %85 = vector.shape_cast %84 : vector<1x1x256xf32> to vector<1x256xf32>
    %86 = vector.broadcast %85 : vector<1x256xf32> to vector<32x256xf32>
    %87 = arith.mulf %83, %86 : vector<32x256xf32>
    %88 = vector.extract_strided_slice %15 {offsets = [7, 0, 0], sizes = [1, 32, 1], strides = [1, 1, 1]} : vector<9x32x1xf32> to vector<1x32x1xf32>
    %89 = vector.shape_cast %88 : vector<1x32x1xf32> to vector<32x1xf32>
    %90 = vector.broadcast %89 : vector<32x1xf32> to vector<32x256xf32>
    %91 = arith.mulf %87, %90 : vector<32x256xf32>
    %92 = arith.addf %82, %91 : vector<32x256xf32>
    %c239_i32 = arith.constant 239 : i32
    %93 = tpu.dynamic_rotate %14 by %c239_i32 dim 1 : vector<32x256xf32>, i32 -> vector<32x256xf32>
    %94 = vector.extract_strided_slice %16 {offsets = [8, 0, 0], sizes = [1, 1, 256], strides = [1, 1, 1]} : vector<9x1x256xf32> to vector<1x1x256xf32>
    %95 = vector.shape_cast %94 : vector<1x1x256xf32> to vector<1x256xf32>
    %96 = vector.broadcast %95 : vector<1x256xf32> to vector<32x256xf32>
    %97 = arith.mulf %93, %96 : vector<32x256xf32>
    %98 = vector.extract_strided_slice %15 {offsets = [8, 0, 0], sizes = [1, 32, 1], strides = [1, 1, 1]} : vector<9x32x1xf32> to vector<1x32x1xf32>
    %99 = vector.shape_cast %98 : vector<1x32x1xf32> to vector<32x1xf32>
    %100 = vector.broadcast %99 : vector<32x1xf32> to vector<32x256xf32>
    %101 = arith.mulf %97, %100 : vector<32x256xf32>
    %102 = arith.addf %92, %101 : vector<32x256xf32>
    %c0_21 = arith.constant 0 : index
    %c0_22 = arith.constant 0 : index
    %103 = vector.load %arg8[%c0_21, %c0_22] : memref<32x1xf32, #tpu.memory_space<vmem>>, vector<32x1xf32>
    %104 = vector.broadcast %103 : vector<32x1xf32> to vector<32x256xf32>
    %105 = arith.addf %102, %104 : vector<32x256xf32>
    %106 = vector.extract_strided_slice %105 {offsets = [0, 0], sizes = [8, 256], strides = [1, 1]} : vector<32x256xf32> to vector<8x256xf32>
    %107 = vector.extract_strided_slice %105 {offsets = [8, 0], sizes = [8, 256], strides = [1, 1]} : vector<32x256xf32> to vector<8x256xf32>
    %108 = vector.extract_strided_slice %105 {offsets = [16, 0], sizes = [8, 256], strides = [1, 1]} : vector<32x256xf32> to vector<8x256xf32>
    %109 = vector.extract_strided_slice %105 {offsets = [24, 0], sizes = [8, 256], strides = [1, 1]} : vector<32x256xf32> to vector<8x256xf32>
    %c0_23 = arith.constant 0 : index
    %c0_24 = arith.constant 0 : index
    %110 = vector.load %arg10[%c0_23, %c0_24] : memref<8x16xf32, #tpu.memory_space<vmem>>, vector<8x16xf32>
    %111 = tpu.concatenate %106, %109 in 0 : vector<8x256xf32>, vector<8x256xf32> -> vector<16x256xf32>
    %cst_25 = arith.constant dense<0.000000e+00> : vector<8x256xf32>
    %112 = tpu.matmul %110, %111, %cst_25 {dimension_numbers = #tpu.dot_dimension_numbers<[1], [0], [0], [1], [0, 0, 1, 1], [], []>} : vector<8x16xf32>, vector<16x256xf32>, vector<8x256xf32> -> vector<8x256xf32>
    %c0_26 = arith.constant 0 : index
    %c0_27 = arith.constant 0 : index
    %113 = vector.load %arg11[%c0_26, %c0_27] : memref<8x1xf32, #tpu.memory_space<vmem>>, vector<8x1xf32>
    %114 = vector.broadcast %113 : vector<8x1xf32> to vector<8x256xf32>
    %115 = arith.addf %112, %114 : vector<8x256xf32>
    %116 = arith.mulf %115, %115 : vector<8x256xf32>
    %cst_28 = arith.constant dense<0.000000e+00> : vector<8xf32>
    %117 = vector.multi_reduction <add>, %116, %cst_28 [1] : vector<8x256xf32> to vector<8xf32>
    %118 = vector.shape_cast %117 : vector<8xf32> to vector<8x1xf32>
    %119 = math.sqrt %118 : vector<8x1xf32>
    %cst_29 = arith.constant 9.99999996E-13 : f32
    %120 = vector.broadcast %cst_29 : f32 to vector<8x1xf32>
    %121 = arith.maximumf %119, %120 : vector<8x1xf32>
    %122 = vector.broadcast %121 : vector<8x1xf32> to vector<8x256xf32>
    %123 = arith.divf %115, %122 : vector<8x256xf32>
    %124 = arith.mulf %107, %107 : vector<8x256xf32>
    %cst_30 = arith.constant dense<0.000000e+00> : vector<8xf32>
    %125 = vector.multi_reduction <add>, %124, %cst_30 [1] : vector<8x256xf32> to vector<8xf32>
    %126 = vector.shape_cast %125 : vector<8xf32> to vector<8x1xf32>
    %127 = math.sqrt %126 : vector<8x1xf32>
    %cst_31 = arith.constant 9.99999996E-13 : f32
    %128 = vector.broadcast %cst_31 : f32 to vector<8x1xf32>
    %129 = arith.maximumf %127, %128 : vector<8x1xf32>
    %130 = vector.broadcast %129 : vector<8x1xf32> to vector<8x256xf32>
    %131 = arith.divf %107, %130 : vector<8x256xf32>
    %132 = arith.mulf %123, %131 : vector<8x256xf32>
    %cst_32 = arith.constant dense<0.000000e+00> : vector<8xf32>
    %133 = vector.multi_reduction <add>, %132, %cst_32 [1] : vector<8x256xf32> to vector<8xf32>
    %134 = vector.shape_cast %133 : vector<8xf32> to vector<8x1xf32>
    %c0_33 = arith.constant 0 : index
    %c0_34 = arith.constant 0 : index
    %135 = vector.load %arg12[%c0_33, %c0_34] : memref<8x1xf32, #tpu.memory_space<vmem>>, vector<8x1xf32>
    %136 = arith.mulf %134, %135 : vector<8x1xf32>
    %cst_35 = arith.constant dense<0xFF800000> : vector<8xf32>
    %137 = vector.multi_reduction <maximumf>, %136, %cst_35 [1] : vector<8x1xf32> to vector<8xf32>
    %138 = vector.shape_cast %137 : vector<8xf32> to vector<8x1xf32>
    %139 = arith.subf %136, %138 : vector<8x1xf32>
    %140 = math.exp %139 : vector<8x1xf32>
    %cst_36 = arith.constant dense<0.000000e+00> : vector<8xf32>
    %141 = vector.multi_reduction <add>, %140, %cst_36 [1] : vector<8x1xf32> to vector<8xf32>
    %142 = vector.shape_cast %141 : vector<8xf32> to vector<8x1xf32>
    %143 = arith.divf %140, %142 : vector<8x1xf32>
    %144 = vector.broadcast %143 : vector<8x1xf32> to vector<8x256xf32>
    %145 = arith.mulf %144, %108 : vector<8x256xf32>
    %c0_37 = arith.constant 0 : index
    %c0_38 = arith.constant 0 : index
    %c0_39 = arith.constant 0 : index
    %146 = vector.load %arg13[%c0_37, %c0_38, %c0_39] : memref<1x8x256xf32, #tpu.memory_space<vmem>>, vector<1x8x256xf32>
    %147 = vector.shape_cast %146 : vector<1x8x256xf32> to vector<8x256xf32>
    %148 = vector.shape_cast %145 : vector<8x256xf32> to vector<1x8x256xf32>
    tpu.vector_store %arg13[%c0_37, %c0_38, %c0_39], %148 {strides = array<i32>} : memref<1x8x256xf32, #tpu.memory_space<vmem>>, vector<1x8x256xf32>,
    return
  }
  func.func @transform_0(%arg0: i32) -> (i32, i32, i32) {
    %c0_i32 = arith.constant 0 : i32
    %c0_i32_0 = arith.constant 0 : i32
    %c0_i32_1 = arith.constant 0 : i32
    return %arg0, %c0_i32, %c0_i32_0 : i32, i32, i32
  }
  func.func @transform_1(%arg0: i32) -> (i32, i32, i32) {
    %c0_i32 = arith.constant 0 : i32
    %c0_i32_0 = arith.constant 0 : i32
    %c0_i32_1 = arith.constant 0 : i32
    return %arg0, %c0_i32, %c0_i32_0 : i32, i32, i32
  }
  func.func @transform_2(%arg0: i32) -> (i32, i32) {
    %c0_i32 = arith.constant 0 : i32
    %c0_i32_0 = arith.constant 0 : i32
    %c0_i32_1 = arith.constant 0 : i32
    return %c0_i32, %c0_i32_0 : i32, i32
  }
  func.func @transform_3(%arg0: i32) -> (i32, i32) {
    %c0_i32 = arith.constant 0 : i32
    %c0_i32_0 = arith.constant 0 : i32
    %c0_i32_1 = arith.constant 0 : i32
    return %c0_i32, %c0_i32_0 : i32, i32
  }
  func.func @transform_4(%arg0: i32) -> (i32, i32) {
    %c0_i32 = arith.constant 0 : i32
    %c0_i32_0 = arith.constant 0 : i32
    %c0_i32_1 = arith.constant 0 : i32
    return %c0_i32, %c0_i32_0 : i32, i32
  }
  func.func @transform_5(%arg0: i32) -> (i32, i32) {
    %c0_i32 = arith.constant 0 : i32
    %c0_i32_0 = arith.constant 0 : i32
    %c0_i32_1 = arith.constant 0 : i32
    return %c0_i32, %c0_i32_0 : i32, i32
  }
  func.func @transform_6(%arg0: i32) -> (i32, i32, i32) {
    %c0_i32 = arith.constant 0 : i32
    %c0_i32_0 = arith.constant 0 : i32
    %c0_i32_1 = arith.constant 0 : i32
    %c0_i32_2 = arith.constant 0 : i32
    return %c0_i32, %c0_i32_0, %c0_i32_1 : i32, i32, i32
  }
  func.func @transform_7(%arg0: i32) -> (i32, i32) {
    %c0_i32 = arith.constant 0 : i32
    %c0_i32_0 = arith.constant 0 : i32
    %c0_i32_1 = arith.constant 0 : i32
    return %c0_i32, %c0_i32_0 : i32, i32
  }
  func.func @transform_8(%arg0: i32) -> (i32, i32, i32) {
    %c0_i32 = arith.constant 0 : i32
    %c0_i32_0 = arith.constant 0 : i32
    %c0_i32_1 = arith.constant 0 : i32
    %c0_i32_2 = arith.constant 0 : i32
    return %c0_i32, %c0_i32_0, %c0_i32_1 : i32, i32, i32
  }
  func.func @transform_9(%arg0: i32) -> (i32, i32) {
    %c0_i32 = arith.constant 0 : i32
    %c0_i32_0 = arith.constant 0 : i32
    %c0_i32_1 = arith.constant 0 : i32
    return %c0_i32, %c0_i32_0 : i32, i32
  }
  func.func @transform_10(%arg0: i32) -> (i32, i32) {
    %c0_i32 = arith.constant 0 : i32
    %c0_i32_0 = arith.constant 0 : i32
    %c0_i32_1 = arith.constant 0 : i32
    return %c0_i32, %c0_i32_0 : i32, i32
  }
  func.func @transform_11(%arg0: i32) -> (i32, i32) {
    %c0_i32 = arith.constant 0 : i32
    %c0_i32_0 = arith.constant 0 : i32
    %c0_i32_1 = arith.constant 0 : i32
    return %c0_i32, %c0_i32_0 : i32, i32
  }
  func.func @transform_12(%arg0: i32) -> (i32, i32, i32) {
    %c0_i32 = arith.constant 0 : i32
    %c0_i32_0 = arith.constant 0 : i32
    %c0_i32_1 = arith.constant 0 : i32
    return %arg0, %c0_i32, %c0_i32_0 : i32, i32, i32
  }
}

</mosaic_0001>

<bundles_post_ra>
// kernel: squeeze.14
= control target key start
LH: loop header
LB: loop body
LE: loop exit
PB: predicated region body
PF: predicated region fallthrough
CT: control target
= control target key end

     0   :  { %vm16_vm0 = vcmask 64512   ;;  %s61_s0 = inlined_call_operand.vmem [shape: f32[8,3,3], index: 0, kind: input, shape index: {}]   ;;  %s62_s1 = inlined_call_operand.vmem [shape: f32[8,9], index: 1, kind: output, shape index: {}]  }
   0x1   :  { %v29_v0 = vld [vmem:[%s61_s0 + $0x8] sm:$0xf]  ;;  %v30_v1 = vld [vmem:[%s61_s0 + $0x4] sm:$0xf]  ;;  %v13_v2 = vld [vmem:[%s61_s0] sm:$0xf] }
   0x2   :  { %8 = vst [vmem:[#allocation0 + $0x10] sm:$0xf] %v29_v0  ;;  %12 = vst [vmem:[#allocation0 + $0x8] sm:$0xf] %v30_v1 }
   0x3   :  { %14 = vst [vmem:[#allocation0] sm:$0xf] %v13_v2 }
   0x9   :  { %v19_v4 = vld [vmem:[#allocation0 + $0x8] sm:$0x7]   ;;  %v24_v5 = vld [vmem:[#allocation0 + $0x10] sm:$0x7]  }
   0xa   :  { %v15_v3 = vld [vmem:[#allocation0] sm:$0x7]   ;;  %31 = vst.msk [vmem:[%s62_s1 + $0x3] sm:$0x7] %vm16_vm0, %v19_v4   ;;  %32 = vst.msk [vmem:[%s62_s1 + $0x6] sm:$0x7] %vm16_vm0, %v24_v5  }
   0xb   :  { %17 = vst.msk [vmem:[%s62_s1] sm:$0x7] %vm16_vm0, %v15_v3  }

// kernel: pa_msa_forward.1
= control target key start
LH: loop header
LB: loop body
LE: loop exit
PB: predicated region body
PF: predicated region fallthrough
CT: control target
= control target key end

     0   :  { %s1730_s21 = smov 0   ;;  %s2472_s0 = inlined_call_operand.vmem [shape: f32[2,8,256], index: 0, kind: input, shape index: {}]   ;;  %s2473_s1 = inlined_call_operand.vmem [shape: f32[2,8,256], index: 1, kind: input, shape index: {}]   ;;  %s2474_s2 = inlined_call_operand.vmem [shape: f32[24,8], index: 2, kind: input, shape index: {}]   ;;  %s2475_s3 = inlined_call_operand.vmem [shape: f32[24,1], index: 3, kind: input, shape index: {}]   ;;  %s2476_s4 = inlined_call_operand.vmem [shape: f32[8,8], index: 4, kind: input, shape index: {}]   ;;  %s2477_s5 = inlined_call_operand.vmem [shape: f32[8,1], index: 5, kind: input, shape index: {}]   ;;  %s2478_s6 = inlined_call_operand.vmem [shape: f32[9,32,1], index: 6, kind: input, shape index: {}]   ;;  %s2479_s7 = inlined_call_operand.vmem [shape: f32[32,1], index: 7, kind: input, shape index: {}]   ;;  %s2480_s8 = inlined_call_operand.vmem [shape: f32[9,1,256], index: 8, kind: input, shape index: {}]   ;;  %s2481_s9 = inlined_call_operand.vmem [shape: f32[8,16], index: 9, kind: input, shape index: {}]   ;;  %s2482_s10 = inlined_call_operand.vmem [shape: f32[8,1], index: 10, kind: input, shape index: {}]   ;;  %s2483_s11 = inlined_call_operand.vmem [shape: f32[8,1], index: 11, kind: input, shape index: {}]   ;;  %s2484_s12 = inlined_call_operand.vmem [shape: f32[2,8,256], index: 12, kind: output, shape index: {}]  }
   0x1 LB: > { %s1590_s22 = sadd.s32 4294967295, %s1653_s21   ;;  %p1594_p0 = scmp.ge.s32.totalorder %s1653_s21, 1  ;;  %s1653_s21 = sphi %s1730_s21, %s22_s21  }
   0x2   : > { %p372_p1 = scmp.lt.s32.totalorder %s1653_s21, 3 }
   0x4   : > { %p373_p2 = pnand %p1594_p0, %p372_p1 }
   0x6   : > { %376 = sbr.rel (%p373_p2) target bundleno = 1163 (0x48b), region = 68 }
   0xd   : > { %p419_p3 = scmp.lt.s32.totalorder %s1590_s22, 1  ;;  %v1655_v0 = vmov 0.0   ;;  %v441_v1 = vld [vmem:[%s2475_s3] sm:$0xff]  ;;  %v1656_v2 = vmov 0   ;;  %vm459_vm0 = vcmask 64512   ;;  %v636_v11 = vld [vmem:[%s2478_s6 + $0x18] sm:$0xff] }
   0xe   : > { %533 = vmatprep.mubr.f32.mxu0 %v1655_v0  ;;  %626 = vmatprep.mubr.f32.mxu1 %v1655_v0  ;;  %v633_v3 = vld [vmem:[%s2478_s6] sm:$0xff]  ;;  %v640_v13 = vld [vmem:[%s2478_s6 + $0x38] sm:$0xff]  ;;  %v439_v22 = vld [vmem:[%s2474_s2 + $0x8] sm:$0xff]  ;;  %s1657_s28 = smov 17   ;;  %s1658_s29 = smov 16   ;;  %vm1394_vm9 = vcmask 130048  }
   0xf   : > { %s2522_s22 = smov (!%p419_p3, %s1590_s22), 1  ;;  %1633 = vset.pattern.permute.xlu0 %v1656_v2  ;;  %1634 = vset.pattern.permute.xlu1 %v1656_v2  ;;  %v438_v4 = vld [vmem:[%s2474_s2] sm:$0xff]  ;;  %v644_v15 = vld [vmem:[%s2478_s6 + $0x58] sm:$0xff]  ;;  %s1660_s13 = smov 1   ;;  %v634_v43 = vld [vmem:[%s2478_s6 + $0x8] sm:$0xff] }
  0x10   : > { %446 = vperm.xlu0 %1633, %v441_v1   ;;  %s1744_s27 = sshll.u32 %s2522_s22, 4  ;;  %725 = vperm.xlu1 %1634, %v633_v3   ;;  %v552_v5 = vld [vmem:[%s2476_s4] sm:$0xff]  ;;  %v648_v17 = vld [vmem:[%s2478_s6 + $0x78] sm:$0xff]  ;;  %s1661_s14 = smov 127   ;;  %v442_v44 = vld [vmem:[%s2475_s3 + $0x8] sm:$0xff] }
  0x11   : > { %s423_s30 = scalar_lea.vmem %s2472_s0, %s1744_s27  ;;  %s428_s15 = scalar_lea.vmem %s2473_s1, %s1744_s27  ;;  %v553_v10 = vld [vmem:[%s2477_s5] sm:$0xff]  ;;  %v652_v19 = vld [vmem:[%s2478_s6 + $0x98] sm:$0xff]  ;;  %v642_v48 = vld [vmem:[%s2478_s6 + $0x48] sm:$0xff] }
  0x12   : > { %v435_v6 = vld [vmem:[%s423_s30 + $0x8] sm:$0xff]  ;;  %v434_v8 = vld [vmem:[%s423_s30] sm:$0xff]  ;;  %v656_v21 = vld [vmem:[%s2478_s6 + $0xb8] sm:$0xff]  ;;  %s1659_s30 = smov 15   ;;  %s1663_s16 = smov 112  }
  0x13   : > { %v437_v7 = vld [vmem:[%s428_s15 + $0x8] sm:$0xff]  ;;  %469 = vmatprep.subr.mxu0 %v435_v6  ;;  %v436_v9 = vld [vmem:[%s428_s15] sm:$0xff]  ;;  %v660_v24 = vld [vmem:[%s2478_s6 + $0xd8] sm:$0xff]  ;;  %s1662_s15 = smov 113   ;;  %s1664_s17 = smov 111  }
  0x14   : > { %562 = vmatprep.subr.mxu1 %v437_v7  ;;  %470 = vmatpush1.msra.mxu0 %v434_v8  ;;  %v637_v12 = vld [vmem:[%s2478_s6 + $0x20] sm:$0xff]  ;;  %v664_v26 = vld [vmem:[%s2478_s6 + $0xf8] sm:$0xff]  ;;  %v638_v49 = vld [vmem:[%s2478_s6 + $0x28] sm:$0xff] }
  0x15   : > { %563 = vmatpush1.msra.mxu1 %v436_v9  ;;  %1601 = vmatmul.mubr.msk.f32.vlgmr.msra.gmra.mrb[0].mxu0 %vm459_vm0, %v438_v4  ;;  %v641_v14 = vld [vmem:[%s2478_s6 + $0x40] sm:$0xff]  ;;  %v668_v28 = vld [vmem:[%s2478_s6 + $0x118] sm:$0xff]  ;;  %v650_v51 = vld [vmem:[%s2478_s6 + $0x88] sm:$0xff] }
  0x16   : > { %1604 = vmatmul.mubr.msk.f32.vlgmr.msra.gmra.mrb[0].mxu1 %vm459_vm0, %v552_v5  ;;  %556 = vperm.xlu0 %1633, %v553_v10   ;;  %v645_v16 = vld [vmem:[%s2478_s6 + $0x60] sm:$0xff]  ;;  %v1358_v40 = vld [vmem:[%s2479_s7 + $0x18] sm:$0xff]  ;;  %v646_v52 = vld [vmem:[%s2478_s6 + $0x68] sm:$0xff] }
  0x17   : > { %740 = vperm.xlu1 %1634, %v636_v11   ;;  %539 = vmatprep.mubr.f32.mxu0 %v1655_v0  ;;  %v649_v18 = vld [vmem:[%s2478_s6 + $0x80] sm:$0xff]  ;;  %v658_v55 = vld [vmem:[%s2478_s6 + $0xc8] sm:$0xff] }
  0x18   : > { %1462 = vmatprep.mubr.f32.mxu1 %v1655_v0  ;;  %v653_v20 = vld [vmem:[%s2478_s6 + $0xa0] sm:$0xff]  ;;  %v654_v56 = vld [vmem:[%s2478_s6 + $0xa8] sm:$0xff] }
  0x19   : > { %v657_v23 = vld [vmem:[%s2478_s6 + $0xc0] sm:$0xff]  ;;  %1602 = vmatmul.mubr.msk.f32.gmra.mrb[2].mxu0 %vm459_vm0, %v439_v22  ;;  %v666_v58 = vld [vmem:[%s2478_s6 + $0x108] sm:$0xff] }
  0x1a   : > { %805 = vperm.xlu0 %1633, %v637_v12   ;;  %545 = vmatprep.mubr.f32.mxu0 %v1655_v0  ;;  %v661_v25 = vld [vmem:[%s2478_s6 + $0xe0] sm:$0xff]  ;;  %v662_v59 = vld [vmem:[%s2478_s6 + $0xe8] sm:$0xff] }
  0x1b   : > { %820 = vperm.xlu1 %1634, %v640_v13   ;;  %v665_v27 = vld [vmem:[%s2478_s6 + $0x100] sm:$0xff] }
  0x1c   : > { %v1355_v41 = vld [vmem:[%s2479_s7] sm:$0xff] }
  0x1e   : > { %885 = vperm.xlu0 %1633, %v641_v14  }
  0x1f   : > { %900 = vperm.xlu1 %1634, %v644_v15  }
  0x22   : > { %965 = vperm.xlu0 %1633, %v645_v16  }
  0x23   : > { %980 = vperm.xlu1 %1634, %v648_v17  }
  0x26   : > { %1001 = vperm.xlu0 %1633, %v649_v18  }
  0x27   : > { %1016 = vperm.xlu1 %1634, %v652_v19  }
  0x2a   : > { %1081 = vperm.xlu0 %1633, %v653_v20  }
  0x2b   : > { %1096 = vperm.xlu1 %1634, %v656_v21   ;;  %v693_v21 = vlaneseq }
  0x2e   : > { %1161 = vperm.xlu0 %1633, %v657_v23  }
  0x2f   : > { %1176 = vperm.xlu1 %1634, %v660_v24   ;;  %v706_v24 = vshrl.u32 %v693_v21, 7 }
  0x32   : > { %1241 = vperm.xlu0 %1633, %v661_v25  }
  0x33   : > { %1256 = vperm.xlu1 %1634, %v664_v26  }
  0x36   : > { %1321 = vperm.xlu0 %1633, %v665_v27   ;;  %v1992_v27 = vand.u32 127, %v693_v21 }
  0x37   : > { %1336 = vperm.xlu1 %1634, %v668_v28   ;;  %v707_v28 = vsub.s32 0, %v706_v24 }
  0x38   : > { %vm695_vm1 = vcmp.lt.s32.totalorder %v1992_v27, 17  ;;  %vm775_vm2 = vcmp.lt.s32.totalorder %v1992_v27, 16  ;;  %vm855_vm3 = vcmp.lt.s32.totalorder %v1992_v27, 15  ;;  %vm935_vm4 = vcmp.lt.s32.totalorder %v1992_v27, 1 }
  0x39   : > { %vm1051_vm5 = vcmp.lt.s32.totalorder %v1992_v27, 127  ;;  %vm1131_vm6 = vcmp.lt.s32.totalorder %v1992_v27, 113  ;;  %vm1211_vm7 = vcmp.lt.s32.totalorder %v1992_v27, 112  ;;  %vm1291_vm8 = vcmp.lt.s32.totalorder %v1992_v27, 111 }
  0x8f   : > { %v447_v29 = vpop.permute.xlu0 %446  ;;  %v1888_v39 = vpop.permute.xlu1 %725 }
  0x95   : > { %v557_v30 = vpop.permute.xlu0 %556 }
  0x96   : > { %v1900_v42 = vpop.permute.xlu1 %740 }
  0x99   : > { %v1912_v47 = vpop.permute.xlu0 %805 }
  0x9a   : > { %v1920_v50 = vpop.permute.xlu1 %820 }
  0x9d   : > { %v1928_v53 = vpop.permute.xlu0 %885 }
  0x9e   : > { %v1930_v54 = vpop.permute.xlu1 %900 }
  0xa1   : > { %v1938_v57 = vpop.permute.xlu0 %965 }
  0xa2   : > { %v1946_v60 = vpop.permute.xlu1 %980 }
  0xa5   : > { %v1002_v61 = vpop.permute.xlu0 %1001 }
  0xa6   : > { %v1017_v62 = vpop.permute.xlu1 %1016 }
  0xa9   : > { %v1948_v63 = vpop.permute.xlu0 %1081 }
  0xaa   : > { %v1950_v0 = vpop.permute.xlu1 %1096 }
  0xad   : > { %v1952_v1 = vpop.permute.xlu0 %1161 }
  0xae   : > { %2499 = vst [vmem:[#allocation4_spill] sm:$0xff] %v1952_v1  ;;  %v1954_v2 = vpop.permute.xlu1 %1176 }
  0xaf   : > { %2500 = vst [vmem:[#allocation5_spill] sm:$0xff] %v1954_v2 }
  0xb1   : > { %v1956_v3 = vpop.permute.xlu0 %1241 }
  0xb2   : > { %2501 = vst [vmem:[#allocation6_spill] sm:$0xff] %v1956_v3  ;;  %v1958_v4 = vpop.permute.xlu1 %1256 }
  0xb3   : > { %2502 = vst [vmem:[#allocation7_spill] sm:$0xff] %v1958_v4 }
  0xb5   : > { %v1960_v5 = vpop.permute.xlu0 %1321 }
  0xb6   : > { %2503 = vst [vmem:[#allocation8_spill] sm:$0xff] %v1960_v5  ;;  %v1962_v6 = vpop.permute.xlu1 %1336 }
  0xb7   : > { %2504 = vst [vmem:[#allocation9_spill] sm:$0xff] %v1962_v6 }
  0xe8   : > { %v535_v31 = vpop.f32.mrb[0].mxu0 }
  0xe9   : > { %v628_v32 = vpop.f32.mrb[0].mxu1  ;;  %v1820_v33 = vadd.f32 %v535_v31, %v447_v29  ;;  %v537_v35 = vpop.f32.mrb[1].mxu0  ;;  %v670_v31 = vld [vmem:[%s2480_s8 + $0x2] sm:$0x3] }
  0xea   : > { %v1822_v34 = vadd.f32 %v628_v32, %v557_v30  ;;  %v630_v36 = vpop.f32.mrb[1].mxu1  ;;  %v1856_v37 = vadd.f32 %v537_v35, %v447_v29  ;;  %v711_v29 = vsub.s32 1, %v706_v24 }
  0xeb   : > { %677 = vrot.lane.b32.xlu0 %v1820_v33, %s1657_s28  ;;  %v1858_v38 = vadd.f32 %v630_v36, %v557_v30  ;;  %v669_v30 = vld [vmem:[%s2480_s8] sm:$0x3]  ;;  %v671_v36 = vld [vmem:[%s2480_s8 + $0x4] sm:$0x3] }
  0xec   : > { %683 = vrot.lane.b32.xlu1 %v1822_v34, %s1657_s28  ;;  %v1908_v45 = vpop.f32.mrb[2].mxu0 }
  0xed   : > { %2497 = vst [vmem:[#allocation2_spill] sm:$0xff] %v1908_v45  ;;  %v1910_v46 = vpop.f32.mrb[3].mxu0 }
  0xee   : > { %2498 = vst [vmem:[#allocation3_spill] sm:$0xff] %v1910_v46 }
  0xef   : > { %759 = vrot.lane.b32.xlu0 %v1820_v33, %s1658_s29 }
  0xf0   : > { %765 = vrot.lane.b32.xlu1 %v1822_v34, %s1658_s29 }
  0xf3   : > { %839 = vrot.lane.b32.xlu0 %v1820_v33, %s1659_s30 }
  0xf4   : > { %845 = vrot.lane.b32.xlu1 %v1822_v34, %s1659_s30 }
  0xf7   : > { %919 = vrot.lane.b32.xlu0 %v1820_v33, %s1660_s13 }
  0xf8   : > { %925 = vrot.lane.b32.xlu1 %v1822_v34, %s1660_s13 }
  0xfb   : > { %1035 = vrot.lane.b32.xlu0 %v1820_v33, %s1661_s14 }
  0xfc   : > { %1041 = vrot.lane.b32.xlu1 %v1822_v34, %s1661_s14 }
  0xff   : > { %1115 = vrot.lane.b32.xlu0 %v1820_v33, %s1662_s15 }
 0x100   : > { %1121 = vrot.lane.b32.xlu1 %v1822_v34, %s1662_s15 }
 0x103   : > { %1195 = vrot.lane.b32.xlu0 %v1820_v33, %s1663_s16 }
 0x104   : > { %1201 = vrot.lane.b32.xlu1 %v1822_v34, %s1663_s16 }
 0x107   : > { %1275 = vrot.lane.b32.xlu0 %v1820_v33, %s1664_s17 }
 0x108   : > { %1281 = vrot.lane.b32.xlu1 %v1822_v34, %s1664_s17 }
 0x10b   : > { %685 = vrot.lane.b32.xlu0 %v1856_v37, %s1657_s28 }
 0x10c   : > { %691 = vrot.lane.b32.xlu1 %v1858_v38, %s1657_s28 }
 0x10f   : > { %767 = vrot.lane.b32.xlu0 %v1856_v37, %s1658_s29 }
 0x110   : > { %773 = vrot.lane.b32.xlu1 %v1858_v38, %s1658_s29 }
 0x113   : > { %847 = vrot.lane.b32.xlu0 %v1856_v37, %s1659_s30 }
 0x114   : > { %853 = vrot.lane.b32.xlu1 %v1858_v38, %s1659_s30 }
 0x117   : > { %927 = vrot.lane.b32.xlu0 %v1856_v37, %s1660_s13 }
 0x118   : > { %933 = vrot.lane.b32.xlu1 %v1858_v38, %s1660_s13 }
 0x11b   : > { %1043 = vrot.lane.b32.xlu0 %v1856_v37, %s1661_s14 }
 0x11c   : > { %1049 = vrot.lane.b32.xlu1 %v1858_v38, %s1661_s14 }
 0x11f   : > { %1123 = vrot.lane.b32.xlu0 %v1856_v37, %s1662_s15 }
 0x120   : > { %1129 = vrot.lane.b32.xlu1 %v1858_v38, %s1662_s15 }
 0x123   : > { %1203 = vrot.lane.b32.xlu0 %v1856_v37, %s1663_s16 }
 0x124   : > { %1209 = vrot.lane.b32.xlu1 %v1858_v38, %s1663_s16 }
 0x127   : > { %1283 = vrot.lane.b32.xlu0 %v1856_v37, %s1664_s17 }
 0x128   : > { %1289 = vrot.lane.b32.xlu1 %v1858_v38, %s1664_s17 }
 0x12b   : > { %1361 = vperm.xlu0 %1633, %v1355_v41   ;;  %v2007_v41 = vmul.f32 %v1017_v62, %v1858_v38  ;;  %v2030_v38 = vrot.slane %v670_v31, %v707_v28 }
 0x12c   : > { %1376 = vperm.xlu1 %1634, %v1358_v40   ;;  %v2004_v40 = vmul.f32 %v1017_v62, %v1822_v34  ;;  %v673_v34 = vld [vmem:[%s2480_s8 + $0xa] sm:$0x3] }
 0x12d   : > { %v2050_v24 = vrot.slane %v673_v34, %v707_v28 }
 0x12f   : > { %451 = vperm.xlu0 %1633, %v442_v44   ;;  %v2013_v44 = vmul.f32 %v1002_v61, %v1856_v37  ;;  %v674_v37 = vld [vmem:[%s2480_s8 + $0xc] sm:$0x3] }
 0x130   : > { %730 = vperm.xlu1 %1634, %v634_v43   ;;  %v672_v43 = vld [vmem:[%s2480_s8 + $0x6] sm:$0x3]  ;;  %v2056_v46 = vrot.slane %v674_v37, %v711_v29 }
 0x131   : > { %v2046_v62 = vrot.slane %v672_v43, %v707_v28  ;;  %v2048_v21 = vrot.slane %v672_v43, %v711_v29 }
 0x133   : > { %810 = vperm.xlu0 %1633, %v638_v49   ;;  %v2019_v49 = vrot.slane %v669_v30, %v707_v28 }
 0x134   : > { %890 = vperm.xlu1 %1634, %v642_v48   ;;  %v2016_v48 = vmul.f32 %v1002_v61, %v1820_v33  ;;  %v2032_v33 = vrot.slane %v670_v31, %v711_v29  ;;  %v2054_v31 = vrot.slane %v674_v37, %v707_v28 }
 0x137   : > { %970 = vperm.xlu0 %1633, %v646_v52   ;;  %v2035_v52 = vrot.slane %v671_v36, %v707_v28 }
 0x138   : > { %1006 = vperm.xlu1 %1634, %v650_v51   ;;  %v2021_v51 = vrot.slane %v669_v30, %v711_v29  ;;  %v2052_v30 = vrot.slane %v673_v34, %v711_v29 }
 0x139   : > { %2505 = vst [vmem:[#allocation10_spill] sm:$0xff] %v2035_v52 }
 0x13b   : > { %1086 = vperm.xlu0 %1633, %v654_v56   ;;  %v676_v56 = vld [vmem:[%s2480_s8 + $0x10] sm:$0x3] }
 0x13c   : > { %1166 = vperm.xlu1 %1634, %v658_v55   ;;  %v675_v55 = vld [vmem:[%s2480_s8 + $0xe] sm:$0x3]  ;;  %v2062_v5 = vrot.slane %v676_v56, %v707_v28  ;;  %v2064_v6 = vrot.slane %v676_v56, %v711_v29 }
 0x13d   : > { %v2058_v45 = vrot.slane %v675_v55, %v707_v28 }
 0x13e   : > { %2507 = vst [vmem:[#allocation12_spill] sm:$0xff] %v2062_v5  ;;  %2508 = vst [vmem:[#allocation13_spill] sm:$0xff] %v2064_v6 }
 0x13f   : > { %1246 = vperm.xlu0 %1633, %v662_v59  }
 0x140   : > { %1326 = vperm.xlu1 %1634, %v666_v58   ;;  %v2043_v58 = vrot.slane %v671_v36, %v711_v29  ;;  %v2060_v36 = vrot.slane %v675_v55, %v711_v29 }
 0x142   : > { %2506 = vst [vmem:[#allocation11_spill] sm:$0xff] %v2043_v58 }
 0x15d   : > { %v678_v8 = vpop.permute.xlu0 %677 }
 0x15e   : > { %v684_v7 = vpop.permute.xlu1 %683 }
 0x161   : > { %v1966_v10 = vpop.permute.xlu0 %759 }
 0x162   : > { %v1964_v9 = vpop.permute.xlu1 %765 }
 0x165   : > { %v1970_v12 = vpop.permute.xlu0 %839 }
 0x166   : > { %v1968_v11 = vpop.permute.xlu1 %845 }
 0x169   : > { %v1974_v14 = vpop.permute.xlu0 %919 }
 0x16a   : > { %v1972_v13 = vpop.permute.xlu1 %925 }
 0x16d   : > { %v1978_v16 = vpop.permute.xlu0 %1035 }
 0x16e   : > { %v1976_v15 = vpop.permute.xlu1 %1041 }
 0x171   : > { %v1982_v18 = vpop.permute.xlu0 %1115 }
 0x172   : > { %v1980_v17 = vpop.permute.xlu1 %1121 }
 0x175   : > { %v1986_v20 = vpop.permute.xlu0 %1195 }
 0x176   : > { %v1984_v19 = vpop.permute.xlu1 %1201 }
 0x179   : > { %v1990_v23 = vpop.permute.xlu0 %1275 }
 0x17a   : > { %v1988_v22 = vpop.permute.xlu1 %1281 }
 0x17d   : > { %v686_v26 = vpop.permute.xlu0 %685 }
 0x17e   : > { %v692_v25 = vpop.permute.xlu1 %691  ;;  %v696_v34 = vsel %vm695_vm1, %v678_v8, %v686_v26  ;;  %v700_v37 = vsel %vm695_vm1, %v686_v26, %v678_v8 }
 0x17f   : > { %v699_v43 = vsel %vm695_vm1, %v684_v7, %v692_v25  ;;  %v703_v3 = vsel %vm695_vm1, %v692_v25, %v684_v7  ;;  %v715_v4 = vmul.f32 %v2019_v49, %v700_v37  ;;  %v716_v6 = vmul.f32 %v2021_v51, %v696_v34 }
 0x181   : > { %v768_v35 = vpop.permute.xlu0 %767 }
 0x182   : > { %v774_v32 = vpop.permute.xlu1 %773  ;;  %v776_v7 = vsel %vm775_vm2, %v1966_v10, %v768_v35  ;;  %v780_v25 = vsel %vm775_vm2, %v768_v35, %v1966_v10  ;;  %v721_v10 = vmul.f32 %v2019_v49, %v703_v3  ;;  %v722_v35 = vmul.f32 %v2021_v51, %v699_v43 }
 0x183   : > { %v779_v28 = vsel %vm775_vm2, %v1964_v9, %v774_v32  ;;  %v783_v29 = vsel %vm775_vm2, %v774_v32, %v1964_v9  ;;  %v796_v1 = vmul.f32 %v2032_v33, %v776_v7 }
 0x184   : > { %v801_v5 = vmul.f32 %v2030_v38, %v783_v29 }
 0x185   : > { %v848_v61 = vpop.permute.xlu0 %847 }
 0x186   : > { %v854_v59 = vpop.permute.xlu1 %853  ;;  %v856_v9 = vsel %vm855_vm3, %v1970_v12, %v848_v61  ;;  %v860_v32 = vsel %vm855_vm3, %v848_v61, %v1970_v12 }
 0x187   : > { %v859_v26 = vsel %vm855_vm3, %v1968_v11, %v854_v59  ;;  %v863_v56 = vsel %vm855_vm3, %v854_v59, %v1968_v11  ;;  %v802_v11 = vmul.f32 %v2032_v33, %v779_v28  ;;  %v795_v59 = vmul.f32 %v2030_v38, %v780_v25 }
 0x188   : > { %v881_v2 = vmul.f32 %v2035_v52, %v863_v56  ;;  %v882_v12 = vmul.f32 %v2043_v58, %v859_v26  ;;  %v875_v3 = vmul.f32 %v2035_v52, %v860_v32  ;;  %v876_v61 = vmul.f32 %v2043_v58, %v856_v9 }
 0x189   : > { %v928_v8 = vpop.permute.xlu0 %927  ;;  %v749_v25 = vmul.f32 %v1900_v42, %v721_v10  ;;  %v750_v26 = vmul.f32 %v1900_v42, %v722_v35  ;;  %v743_v56 = vmul.f32 %v1888_v39, %v715_v4  ;;  %v744_v9 = vmul.f32 %v1888_v39, %v716_v6 }
 0x18a   : > { %v934_v55 = vpop.permute.xlu1 %933  ;;  %v936_v29 = vsel %vm935_vm4, %v1974_v14, %v928_v8  ;;  %v940_v7 = vsel %vm935_vm4, %v928_v8, %v1974_v14  ;;  %v829_v32 = vmul.f32 %v1920_v50, %v801_v5  ;;  %v824_v58 = vmul.f32 %v1912_v47, %v796_v1 }
 0x18b   : > { %v939_v34 = vsel %vm935_vm4, %v1972_v13, %v934_v55  ;;  %v943_v28 = vsel %vm935_vm4, %v934_v55, %v1972_v13  ;;  %v830_v13 = vmul.f32 %v1920_v50, %v802_v11  ;;  %v823_v55 = vmul.f32 %v1912_v47, %v795_v59 }
 0x18c   : > { %v961_v52 = vmul.f32 %v2046_v62, %v943_v28  ;;  %v962_v14 = vmul.f32 %v2048_v21, %v939_v34  ;;  %v955_v8 = vmul.f32 %v2046_v62, %v940_v7  ;;  %v956_v42 = vmul.f32 %v2048_v21, %v936_v29 }
 0x18d   : > { %v1044_v37 = vpop.permute.xlu0 %1043  ;;  %v909_v39 = vmul.f32 %v1930_v54, %v881_v2  ;;  %v910_v50 = vmul.f32 %v1930_v54, %v882_v12  ;;  %v903_v5 = vmul.f32 %v1928_v53, %v875_v3  ;;  %v904_v47 = vmul.f32 %v1928_v53, %v876_v61 }
 0x18e   : > { %v1050_v43 = vpop.permute.xlu1 %1049  ;;  %v1052_v35 = vsel %vm1051_vm5, %v1978_v16, %v1044_v37  ;;  %v1056_v54 = vsel %vm1051_vm5, %v1044_v37, %v1978_v16  ;;  %v837_v2 = vadd.f32 %v829_v32, %v749_v25  ;;  %v838_v53 = vadd.f32 %v830_v13, %v750_v26 }
 0x18f   : > { %v1055_v1 = vsel %vm1051_vm5, %v1976_v15, %v1050_v43  ;;  %v1059_v6 = vsel %vm1051_vm5, %v1050_v43, %v1976_v15  ;;  %v831_v11 = vadd.f32 %v823_v55, %v743_v56  ;;  %v832_v59 = vadd.f32 %v824_v58, %v744_v9 }
 0x190   : > { %v989_v12 = vmul.f32 %v1946_v60, %v961_v52  ;;  %v990_v3 = vmul.f32 %v1946_v60, %v962_v14  ;;  %v983_v15 = vmul.f32 %v1938_v57, %v955_v8  ;;  %v984_v61 = vmul.f32 %v1938_v57, %v956_v42 }
 0x191   : > { %v1124_v4 = vpop.permute.xlu0 %1123  ;;  %v1077_v28 = vmul.f32 %v2050_v24, %v1055_v1  ;;  %v1078_v16 = vmul.f32 %v2052_v30, %v1059_v6  ;;  %v1071_v37 = vmul.f32 %v2050_v24, %v1052_v35  ;;  %v1072_v29 = vmul.f32 %v2052_v30, %v1056_v54 }
 0x192   : > { %v1130_v10 = vpop.permute.xlu1 %1129  ;;  %v917_v7 = vadd.f32 %v909_v39, %v837_v2  ;;  %v918_v58 = vadd.f32 %v910_v50, %v838_v53  ;;  %v911_v25 = vadd.f32 %v903_v5, %v831_v11  ;;  %v912_v52 = vadd.f32 %v904_v47, %v832_v59  ;;  %v2509_v59 = vld [vmem:[#allocation5_spill] sm:$0xff] }
 0x193   : > { %v1135_v60 = vsel %vm1131_vm6, %v1980_v17, %v1130_v10  ;;  %v1139_v57 = vsel %vm1131_vm6, %v1130_v10, %v1980_v17  ;;  %v1132_v26 = vsel %vm1131_vm6, %v1982_v18, %v1124_v4  ;;  %v1136_v56 = vsel %vm1131_vm6, %v1124_v4, %v1982_v18 }
 0x194   : > { %v997_v9 = vadd.f32 %v989_v12, %v917_v7  ;;  %v998_v32 = vadd.f32 %v990_v3, %v918_v58  ;;  %v991_v13 = vadd.f32 %v983_v15, %v911_v25  ;;  %v992_v55 = vadd.f32 %v984_v61, %v912_v52  ;;  %v2510_v3 = vld [vmem:[#allocation4_spill] sm:$0xff]  ;;  %v2513_v52 = vld [vmem:[#allocation7_spill] sm:$0xff] }
 0x195   : > { %v1204_v34 = vpop.permute.xlu0 %1203  ;;  %v1105_v14 = vmul.f32 %v1950_v0, %v1077_v28  ;;  %v1106_v8 = vmul.f32 %v1950_v0, %v1078_v16  ;;  %v1099_v42 = vmul.f32 %v1948_v63, %v1071_v37  ;;  %v1100_v17 = vmul.f32 %v1948_v63, %v1072_v29  ;;  %v2512_v28 = vld [vmem:[#allocation13_spill] sm:$0xff] }
 0x196   : > { %v1210_v43 = vpop.permute.xlu1 %1209  ;;  %v1157_v10 = vmul.f32 %v2054_v31, %v1135_v60  ;;  %v1158_v39 = vmul.f32 %v2056_v46, %v1139_v57  ;;  %v1151_v50 = vmul.f32 %v2054_v31, %v1132_v26  ;;  %v1152_v18 = vmul.f32 %v2056_v46, %v1136_v56  ;;  %v2514_v26 = vld [vmem:[#allocation6_spill] sm:$0xff] }
 0x197   : > { %v1215_v47 = vsel %vm1211_vm7, %v1984_v19, %v1210_v43  ;;  %v1219_v0 = vsel %vm1211_vm7, %v1210_v43, %v1984_v19  ;;  %v1212_v63 = vsel %vm1211_vm7, %v1986_v20, %v1204_v34  ;;  %v1216_v1 = vsel %vm1211_vm7, %v1204_v34, %v1986_v20  ;;  %v2511_v43 = vld [vmem:[#allocation12_spill] sm:$0xff] }
 0x198   : > { %v1034_v6 = vadd.f32 %v2007_v41, %v998_v32  ;;  %v1033_v35 = vadd.f32 %v2004_v40, %v997_v9  ;;  %v1028_v54 = vadd.f32 %v2013_v44, %v992_v55  ;;  %v1027_v2 = vadd.f32 %v2016_v48, %v991_v13 }
 0x199   : > { %v1284_v5 = vpop.permute.xlu0 %1283  ;;  %v1237_v41 = vmul.f32 %v2058_v45, %v1215_v47  ;;  %v1238_v44 = vmul.f32 %v2060_v36, %v1219_v0  ;;  %v1231_v48 = vmul.f32 %v2058_v45, %v1212_v63  ;;  %v1232_v11 = vmul.f32 %v2060_v36, %v1216_v1 }
 0x19a   : > { %v1290_v4 = vpop.permute.xlu1 %1289  ;;  %v1292_v20 = vsel %vm1291_vm8, %v1990_v23, %v1284_v5  ;;  %v1296_v40 = vsel %vm1291_vm8, %v1284_v5, %v1990_v23  ;;  %v1185_v12 = vmul.f32 %v2509_v59, %v1157_v10  ;;  %v1179_v15 = vmul.f32 %v2510_v3, %v1151_v50 }
 0x19b   : > { %v1295_v19 = vsel %vm1291_vm8, %v1988_v22, %v1290_v4  ;;  %v1299_v53 = vsel %vm1291_vm8, %v1290_v4, %v1988_v22  ;;  %v1186_v22 = vmul.f32 %v2509_v59, %v1158_v39  ;;  %v1180_v61 = vmul.f32 %v2510_v3, %v1152_v18  ;;  %v2515_v39 = vld [vmem:[#allocation9_spill] sm:$0xff]  ;;  %v1387_v59 = vld [vmem:[%s2481_s9] sm:$0xff] }
 0x19c   : > { %v1317_v34 = vmul.f32 %v2511_v43, %v1295_v19  ;;  %v1318_v23 = vmul.f32 %v2512_v28, %v1299_v53  ;;  %v1311_v16 = vmul.f32 %v2511_v43, %v1292_v20  ;;  %v1312_v37 = vmul.f32 %v2512_v28, %v1296_v40  ;;  %v1388_v3 = vld [vmem:[%s2482_s10] sm:$0xff] }
 0x19d   : > { %v1113_v29 = vadd.f32 %v1105_v14, %v1033_v35  ;;  %v1114_v7 = vadd.f32 %v1106_v8, %v1034_v6  ;;  %v1107_v58 = vadd.f32 %v1099_v42, %v1027_v2  ;;  %v1108_v25 = vadd.f32 %v1100_v17, %v1028_v54  ;;  %v2516_v14 = vld [vmem:[#allocation8_spill] sm:$0xff] }
 0x19e   : > { %v1265_v60 = vmul.f32 %v2513_v52, %v1237_v41  ;;  %v1266_v57 = vmul.f32 %v2513_v52, %v1238_v44  ;;  %v1259_v56 = vmul.f32 %v2514_v26, %v1231_v48  ;;  %v1260_v9 = vmul.f32 %v2514_v26, %v1232_v11  ;;  %v2517_v48 = vld [vmem:[#allocation2_spill] sm:$0xff] }
 0x19f   : > { %v1193_v32 = vadd.f32 %v1185_v12, %v1113_v29  ;;  %v1194_v13 = vadd.f32 %v1186_v22, %v1114_v7  ;;  %v1187_v55 = vadd.f32 %v1179_v15, %v1107_v58  ;;  %v1188_v10 = vadd.f32 %v1180_v61, %v1108_v25  ;;  %v2518_v12 = vld [vmem:[#allocation3_spill] sm:$0xff] }
 0x1a0   : > { %v1345_v50 = vmul.f32 %v2515_v39, %v1317_v34  ;;  %v1346_v18 = vmul.f32 %v2515_v39, %v1318_v23  ;;  %v1339_v8 = vmul.f32 %v2516_v14, %v1311_v16  ;;  %v1340_v42 = vmul.f32 %v2516_v14, %v1312_v37  ;;  %v1356_v15 = vld [vmem:[%s2479_s7 + $0x8] sm:$0xff] }
 0x1a1   : > { %v1274_v17 = vadd.f32 %v1266_v57, %v1194_v13  ;;  %v1273_v4 = vadd.f32 %v1265_v60, %v1193_v32  ;;  %v1268_v5 = vadd.f32 %v1260_v9, %v1188_v10  ;;  %v1267_v47 = vadd.f32 %v1259_v56, %v1187_v55 }
 0x1a3   : > { %v1354_v0 = vadd.f32 %v1346_v18, %v1274_v17  ;;  %v1353_v63 = vadd.f32 %v1345_v50, %v1273_v4  ;;  %v1348_v1 = vadd.f32 %v1340_v42, %v1268_v5  ;;  %v1347_v6 = vadd.f32 %v1339_v8, %v1267_v47 }
 0x1aa   : > { %v1362_v54 = vpop.permute.xlu0 %1361 }
 0x1ab   : > { %v1377_v35 = vpop.permute.xlu1 %1376  ;;  %v1379_v53 = vadd.f32 %v1362_v54, %v1347_v6  ;;  %v1380_v20 = vadd.f32 %v1362_v54, %v1348_v1 }
 0x1ac   : > { %v1385_v2 = vadd.f32 %v1377_v35, %v1353_v63  ;;  %v1386_v19 = vadd.f32 %v1377_v35, %v1354_v0 }
 0x1ae   : > { %v1611_v40 = vpack.c.bf16 %v1386_v19, %v1380_v20  ;;  %v1613_v41 = vpack.c.bf16 %v1385_v2, %v1379_v53  ;;  %v452_v44 = vpop.permute.xlu0 %451 }
 0x1af   : > { %v2231_v11 = vadd.f32 %v2517_v48, %v452_v44  ;;  %v2245_v22 = vadd.f32 %v2518_v12, %v452_v44  ;;  %v731_v61 = vpop.permute.xlu1 %730  ;;  %v2520_v44 = vld [vmem:[#allocation11_spill] sm:$0xff] }
 0x1b0   : > { %1612 = vmatprep.subr.bf16.mxu1 %v1611_v40  ;;  %v2519_v40 = vld [vmem:[#allocation10_spill] sm:$0xff] }
 0x1b1   : > { %1614 = vmatpush1.bf16.msra.mxu1 %v1613_v41  ;;  %841 = vrot.lane.b32.xlu1 %v2231_v11, %s1659_s30 }
 0x1b2   : > { %679 = vrot.lane.b32.xlu0 %v2231_v11, %s1657_s28  ;;  %v811_v23 = vpop.permute.xlu0 %810 }
 0x1b3   : > { %v891_v34 = vpop.permute.xlu1 %890 }
 0x1b4   : > { %1605 = vmatmul.mubr.msk.f32.vlgmr.msra.gmra.mrb[2].mxu1 %vm1394_vm9, %v1387_v59 }
 0x1b5   : > { %1117 = vrot.lane.b32.xlu1 %v2231_v11, %s1662_s15 }
 0x1b6   : > { %761 = vrot.lane.b32.xlu0 %v2231_v11, %s1658_s29  ;;  %v971_v37 = vpop.permute.xlu0 %970 }
 0x1b7   : > { %v1007_v16 = vpop.permute.xlu1 %1006 }
 0x1b9   : > { %687 = vrot.lane.b32.xlu1 %v2245_v22, %s1657_s28 }
 0x1ba   : > { %921 = vrot.lane.b32.xlu0 %v2231_v11, %s1660_s13  ;;  %v1087_v7 = vpop.permute.xlu0 %1086 }
 0x1bb   : > { %v2277_v29 = vpop.permute.xlu1 %1166 }
 0x1bd   : > { %769 = vrot.lane.b32.xlu1 %v2245_v22, %s1658_s29 }
 0x1be   : > { %1037 = vrot.lane.b32.xlu0 %v2231_v11, %s1661_s14  ;;  %v2281_v25 = vpop.permute.xlu0 %1246 }
 0x1bf   : > { %v2279_v58 = vpop.permute.xlu1 %1326 }
 0x1c1   : > { %929 = vrot.lane.b32.xlu1 %v2245_v22, %s1660_s13 }
 0x1c2   : > { %1197 = vrot.lane.b32.xlu0 %v2231_v11, %s1663_s16 }
 0x1c5   : > { %1045 = vrot.lane.b32.xlu1 %v2245_v22, %s1661_s14 }
 0x1c6   : > { %849 = vrot.lane.b32.xlu0 %v2245_v22, %s1659_s30 }
 0x1c9   : > { %1205 = vrot.lane.b32.xlu1 %v2245_v22, %s1663_s16 }
 0x1ca   : > { %1277 = vrot.lane.b32.xlu0 %v2231_v11, %s1664_s17 }
 0x1cd   : > { %1285 = vrot.lane.b32.xlu1 %v2245_v22, %s1664_s17 }
 0x1ce   : > { %1125 = vrot.lane.b32.xlu0 %v2245_v22, %s1662_s15 }
 0x1d1   : > { %1391 = vperm.xlu1 %1634, %v1388_v3  }
 0x1d2   : > { %1366 = vperm.xlu0 %1633, %v1356_v15  }
 0x223   : > { %v842_v52 = vpop.permute.xlu1 %841 }
 0x224   : > { %v680_v60 = vpop.permute.xlu0 %679 }
 0x227   : > { %v1118_v57 = vpop.permute.xlu1 %1117 }
 0x228   : > { %v762_v26 = vpop.permute.xlu0 %761 }
 0x22b   : > { %v688_v56 = vpop.permute.xlu1 %687 }
 0x22c   : > { %v922_v9 = vpop.permute.xlu0 %921  ;;  %v697_v39 = vsel %vm695_vm1, %v680_v60, %v688_v56  ;;  %v701_v50 = vsel %vm695_vm1, %v688_v56, %v680_v60 }
 0x22d   : > { %v717_v17 = vmul.f32 %v2019_v49, %v701_v50  ;;  %v718_v4 = vmul.f32 %v2021_v51, %v697_v39  ;;  %v1021_v39 = vmul.f32 %v1007_v16, %v2231_v11  ;;  %v1022_v50 = vmul.f32 %v1007_v16, %v2245_v22 }
 0x22f   : > { %v770_v32 = vpop.permute.xlu1 %769  ;;  %v745_v53 = vmul.f32 %v731_v61, %v717_v17  ;;  %v746_v20 = vmul.f32 %v731_v61, %v718_v4 }
 0x230   : > { %v1038_v13 = vpop.permute.xlu0 %1037  ;;  %v777_v55 = vsel %vm775_vm2, %v762_v26, %v770_v32  ;;  %v781_v10 = vsel %vm775_vm2, %v770_v32, %v762_v26 }
 0x231   : > { %v797_v18 = vmul.f32 %v2030_v38, %v781_v10  ;;  %v798_v14 = vmul.f32 %v2032_v33, %v777_v55 }
 0x233   : > { %v930_v8 = vpop.permute.xlu1 %929  ;;  %v825_v0 = vmul.f32 %v811_v23, %v797_v18  ;;  %v826_v63 = vmul.f32 %v811_v23, %v798_v14 }
 0x234   : > { %v1198_v42 = vpop.permute.xlu0 %1197  ;;  %v937_v5 = vsel %vm935_vm4, %v922_v9, %v930_v8  ;;  %v941_v47 = vsel %vm935_vm4, %v930_v8, %v922_v9 }
 0x235   : > { %v957_v35 = vmul.f32 %v2046_v62, %v941_v47  ;;  %v958_v54 = vmul.f32 %v2048_v21, %v937_v5  ;;  %v833_v3 = vadd.f32 %v825_v0, %v745_v53  ;;  %v834_v15 = vadd.f32 %v826_v63, %v746_v20 }
 0x237   : > { %v1046_v1 = vpop.permute.xlu1 %1045  ;;  %v985_v56 = vmul.f32 %v971_v37, %v957_v35  ;;  %v986_v9 = vmul.f32 %v971_v37, %v958_v54 }
 0x238   : > { %v850_v6 = vpop.permute.xlu0 %849  ;;  %v1053_v59 = vsel %vm1051_vm5, %v1038_v13, %v1046_v1  ;;  %v1057_v12 = vsel %vm1051_vm5, %v1046_v1, %v1038_v13 }
 0x239   : > { %v857_v2 = vsel %vm855_vm3, %v842_v52, %v850_v6  ;;  %v861_v19 = vsel %vm855_vm3, %v850_v6, %v842_v52  ;;  %v1073_v52 = vmul.f32 %v2050_v24, %v1053_v59  ;;  %v1074_v61 = vmul.f32 %v2052_v30, %v1057_v12 }
 0x23a   : > { %v877_v41 = vmul.f32 %v2519_v40, %v861_v19  ;;  %v878_v48 = vmul.f32 %v2520_v44, %v857_v2 }
 0x23b   : > { %v1206_v10 = vpop.permute.xlu1 %1205  ;;  %v1101_v8 = vmul.f32 %v1087_v7, %v1073_v52  ;;  %v1102_v17 = vmul.f32 %v1087_v7, %v1074_v61 }
 0x23c   : > { %v905_v23 = vmul.f32 %v891_v34, %v877_v41  ;;  %v906_v60 = vmul.f32 %v891_v34, %v878_v48  ;;  %v1278_v26 = vpop.permute.xlu0 %1277  ;;  %v1213_v47 = vsel %vm1211_vm7, %v1198_v42, %v1206_v10  ;;  %v1217_v11 = vsel %vm1211_vm7, %v1206_v10, %v1198_v42 }
 0x23d   : > { %v1233_v7 = vmul.f32 %v2058_v45, %v1213_v47  ;;  %v1234_v35 = vmul.f32 %v2060_v36, %v1217_v11 }
 0x23e   : > { %v913_v32 = vadd.f32 %v905_v23, %v833_v3  ;;  %v914_v55 = vadd.f32 %v906_v60, %v834_v15 }
 0x23f   : > { %v1286_v0 = vpop.permute.xlu1 %1285  ;;  %v1261_v53 = vmul.f32 %v2281_v25, %v1233_v7  ;;  %v1262_v20 = vmul.f32 %v2281_v25, %v1234_v35  ;;  %v635_v25 = vld [vmem:[%s2478_s6 + $0x10] sm:$0xff] }
 0x240   : > { %v993_v18 = vadd.f32 %v985_v56, %v913_v32  ;;  %v994_v13 = vadd.f32 %v986_v9, %v914_v55  ;;  %v1126_v14 = vpop.permute.xlu0 %1125  ;;  %v1293_v54 = vsel %vm1291_vm8, %v1278_v26, %v1286_v0  ;;  %v1297_v42 = vsel %vm1291_vm8, %v1286_v0, %v1278_v26  ;;  %v639_v32 = vld [vmem:[%s2478_s6 + $0x30] sm:$0xff] }
 0x241   : > { %v1133_v34 = vsel %vm1131_vm6, %v1118_v57, %v1126_v14  ;;  %v1137_v37 = vsel %vm1131_vm6, %v1126_v14, %v1118_v57  ;;  %v1313_v41 = vmul.f32 %v2511_v43, %v1293_v54 }
 0x242   : > { %v1029_v4 = vadd.f32 %v1021_v39, %v993_v18  ;;  %v1030_v5 = vadd.f32 %v1022_v50, %v994_v13  ;;  %v1153_v22 = vmul.f32 %v2054_v31, %v1133_v34  ;;  %v1154_v16 = vmul.f32 %v2056_v46, %v1137_v37 }
 0x243   : > { %v1341_v12 = vmul.f32 %v2279_v58, %v1313_v41 }
 0x244   : > { %v1109_v63 = vadd.f32 %v1101_v8, %v1029_v4  ;;  %v1110_v1 = vadd.f32 %v1102_v17, %v1030_v5  ;;  %v1181_v6 = vmul.f32 %v2277_v29, %v1153_v22  ;;  %v1182_v57 = vmul.f32 %v2277_v29, %v1154_v16 }
 0x245   : > { %v1314_v29 = vmul.f32 %v2512_v28, %v1297_v42 }
 0x246   : > { %v1189_v2 = vadd.f32 %v1181_v6, %v1109_v63  ;;  %v1190_v19 = vadd.f32 %v1182_v57, %v1110_v1 }
 0x247   : > { %v1342_v3 = vmul.f32 %v2279_v58, %v1314_v29  ;;  %v440_v58 = vld [vmem:[%s2474_s2 + $0x10] sm:$0xff] }
 0x248   : > { %v1269_v48 = vadd.f32 %v1261_v53, %v1189_v2  ;;  %v1270_v59 = vadd.f32 %v1262_v20, %v1190_v19  ;;  %1603 = vmatmul.mubr.msk.f32.gmra.mrb[4].mxu0 %vm459_vm0, %v440_v58  ;;  %v443_v29 = vld [vmem:[%s2475_s3 + $0x10] sm:$0xff] }
 0x249   : > { %v655_v58 = vld [vmem:[%s2478_s6 + $0xb0] sm:$0xff] }
 0x24a   : > { %v1349_v15 = vadd.f32 %v1341_v12, %v1269_v48  ;;  %v1350_v23 = vadd.f32 %v1342_v3, %v1270_v59  ;;  %v643_v59 = vld [vmem:[%s2478_s6 + $0x50] sm:$0xff] }
 0x250   : > { %v1392_v55 = vpop.permute.xlu1 %1391 }
 0x251   : > { %v1367_v60 = vpop.permute.xlu0 %1366 }
 0x252   : > { %v1381_v26 = vadd.f32 %v1367_v60, %v1349_v15  ;;  %v1382_v56 = vadd.f32 %v1367_v60, %v1350_v23 }
 0x254   : > { %v1485_v9 = vmul.f32 %v1381_v26, %v1381_v26  ;;  %v1486_v52 = vmul.f32 %v1382_v56, %v1382_v56 }
 0x256   : > { %v1487_v61 = vadd.f32 %v1486_v52, %v1485_v9  ;;  %v647_v9 = vld [vmem:[%s2478_s6 + $0x70] sm:$0xff] }
 0x258   : > { %1488 = vadd.xlane.f32.xlu1 %v1487_v61  ;;  %v651_v61 = vld [vmem:[%s2478_s6 + $0x90] sm:$0xff] }
 0x269   : > { %735 = vperm.xlu1 %1634, %v635_v25  }
 0x26d   : > { %815 = vperm.xlu1 %1634, %v639_v32   ;;  %v659_v32 = vld [vmem:[%s2478_s6 + $0xd0] sm:$0xff] }
 0x287   : > { %v1464_v10 = vpop.f32.mrb[2].mxu1 }
 0x288   : > { %v1465_v39 = vadd.f32 %v1464_v10, %v1392_v55  ;;  %v1466_v50 = vpop.f32.mrb[3].mxu1 }
 0x289   : > { %v1467_v18 = vadd.f32 %v1466_v50, %v1392_v55  ;;  %v663_v55 = vld [vmem:[%s2478_s6 + $0xf0] sm:$0xff] }
 0x28a   : > { %v1469_v13 = vmul.f32 %v1465_v39, %v1465_v39 }
 0x28b   : > { %v1470_v14 = vmul.f32 %v1467_v18, %v1467_v18 }
 0x28d   : > { %v1471_v34 = vadd.f32 %v1470_v14, %v1469_v13 }
 0x28f   : > { %1472 = vadd.xlane.f32.xlu0 %v1471_v34 }
 0x2e5   : > { %v1489_v37 = vpop.xlane.xlu1 %1488 }
 0x2e6   : > { %1635 = vrsqrt.f32 %v1489_v37  ;;  %vm1492_vm10 = vcmp.eq.f32.partialorder %v1489_v37, inf  ;;  %v1495_v47 = vand.u32 2147483648, %v1489_v37  ;;  %vm1494_vm11 = vcmp.eq.f32.partialorder %v1489_v37, 0.0 }
 0x2e9   : > { %v736_v14 = vpop.permute.xlu1 %735 }
 0x2f0   : > { %v1636_v8 = vpop.eup %1635 }
 0x2f1   : > { %v1491_v4 = vmul.f32 %v1636_v8, %v1489_v37 }
 0x2f3   : > { %v1493_v5 = vsel %vm1492_vm10, %v1489_v37, %v1491_v4  ;;  %v816_v37 = vpop.permute.xlu1 %815 }
 0x2f4   : > { %v1496_v11 = vsel %vm1494_vm11, %v1495_v47, %v1493_v5 }
 0x2f5   : > { %v1497_v16 = vmax.f32 %v1496_v11, 1e-12 }
 0x31b   : > { %v547_v48 = vpop.f32.mrb[4].mxu0 }
 0x31c   : > { %v1473_v17 = vpop.xlane.xlu0 %1472  ;;  %v549_v12 = vpop.f32.mrb[5].mxu0 }
 0x31d   : > { %1637 = vrsqrt.f32 %v1473_v17  ;;  %vm1476_vm12 = vcmp.eq.f32.partialorder %v1473_v17, inf  ;;  %v1479_v63 = vand.u32 2147483648, %v1473_v17  ;;  %vm1478_vm13 = vcmp.eq.f32.partialorder %v1473_v17, 0.0 }
 0x31e   : > { %1639 = vrcp.f32 %v1497_v16 }
 0x327   : > { %v1638_v22 = vpop.eup %1637 }
 0x328   : > { %v1475_v0 = vmul.f32 %v1638_v22, %v1473_v17  ;;  %v1640_v7 = vpop.eup %1639 }
 0x329   : > { %v1499_v2 = vmul.f32 %v1640_v7, %v1381_v26  ;;  %v1500_v19 = vmul.f32 %v1640_v7, %v1382_v56  ;;  %v1506_v26 = vld [vmem:[%s2483_s11] sm:$0xff] }
 0x32a   : > { %v1477_v1 = vsel %vm1476_vm12, %v1473_v17, %v1475_v0 }
 0x32b   : > { %v1480_v6 = vsel %vm1478_vm13, %v1479_v63, %v1477_v1 }
 0x32c   : > { %v1481_v57 = vmax.f32 %v1480_v6, 1e-12 }
 0x32e   : > { %1641 = vrcp.f32 %v1481_v57 }
 0x338   : > { %v1642_v35 = vpop.eup %1641 }
 0x339   : > { %v1483_v54 = vmul.f32 %v1642_v35, %v1465_v39  ;;  %v1484_v42 = vmul.f32 %v1642_v35, %v1467_v18  ;;  %v667_v39 = vld [vmem:[%s2478_s6 + $0x110] sm:$0xff] }
 0x33a   : > { %v1357_v18 = vld [vmem:[%s2479_s7 + $0x10] sm:$0xff] }
 0x33b   : > { %v1501_v53 = vmul.f32 %v1499_v2, %v1483_v54  ;;  %v1502_v20 = vmul.f32 %v1500_v19, %v1484_v42 }
 0x33d   : > { %v1503_v41 = vadd.f32 %v1502_v20, %v1501_v53 }
 0x33f   : > { %1504 = vadd.xlane.f32.xlu0 %v1503_v41 }
 0x355   : > { %456 = vperm.xlu0 %1633, %v443_v29  }
 0x359   : > { %895 = vperm.xlu0 %1633, %v643_v59  }
 0x3cc   : > { %v1505_v3 = vpop.xlane.xlu0 %1504 }
 0x3cd   : > { %v1507_v56 = vmul.f32 %v1506_v26, %v1505_v3 }
 0x3cf   : > { %v1508_v52 = vsub.f32 %v1507_v56, %v1507_v56 }
 0x3d1   : > { %v1509_v25 = vmul.f32 1.442695, %v1508_v52 }
 0x3d3   : > { %1643 = vpow2.f32 %v1509_v25 }
 0x3d4   : > { %v457_v15 = vpop.permute.xlu0 %456 }
 0x3d5   : > { %v2355_v23 = vadd.f32 %v547_v48, %v457_v15  ;;  %v2357_v60 = vadd.f32 %v549_v12, %v457_v15 }
 0x3d7   : > { %689 = vrot.lane.b32.xlu0 %v2357_v60, %s1657_s28  ;;  %681 = vrot.lane.b32.xlu1 %v2355_v23, %s1657_s28 }
 0x3d8   : > { %v896_v34 = vpop.permute.xlu0 %895 }
 0x3db   : > { %771 = vrot.lane.b32.xlu0 %v2357_v60, %s1658_s29  ;;  %763 = vrot.lane.b32.xlu1 %v2355_v23, %s1658_s29 }
 0x3dd   : > { %v1644_v10 = vpop.eup %1643 }
 0x3de   : > { %1645 = vrcp.f32 %v1644_v10 }
 0x3df   : > { %843 = vrot.lane.b32.xlu0 %v2355_v23, %s1659_s30  ;;  %975 = vperm.xlu1 %1634, %v647_v9  }
 0x3e3   : > { %1011 = vperm.xlu0 %1633, %v651_v61   ;;  %851 = vrot.lane.b32.xlu1 %v2357_v60, %s1659_s30 }
 0x3e7   : > { %931 = vrot.lane.b32.xlu0 %v2357_v60, %s1660_s13  ;;  %923 = vrot.lane.b32.xlu1 %v2355_v23, %s1660_s13 }
 0x3e8   : > { %v1646_v50 = vpop.eup %1645 }
 0x3e9   : > { %v1513_v13 = vmul.f32 %v1646_v50, %v1644_v10 }
 0x3eb   : > { %1171 = vperm.xlu0 %1633, %v659_v32   ;;  %1091 = vperm.xlu1 %1634, %v655_v58  }
 0x3ef   : > { %1047 = vrot.lane.b32.xlu0 %v2357_v60, %s1661_s14  ;;  %1039 = vrot.lane.b32.xlu1 %v2355_v23, %s1661_s14 }
 0x3f3   : > { %1119 = vrot.lane.b32.xlu0 %v2355_v23, %s1662_s15  ;;  %1251 = vperm.xlu1 %1634, %v663_v55  }
 0x3f7   : > { %1331 = vperm.xlu0 %1633, %v667_v39   ;;  %1127 = vrot.lane.b32.xlu1 %v2357_v60, %s1662_s15 }
 0x3fb   : > { %1207 = vrot.lane.b32.xlu0 %v2357_v60, %s1663_s16  ;;  %1199 = vrot.lane.b32.xlu1 %v2355_v23, %s1663_s16 }
 0x3ff   : > { %1287 = vrot.lane.b32.xlu0 %v2357_v60, %s1664_s17  ;;  %1279 = vrot.lane.b32.xlu1 %v2355_v23, %s1664_s17  ;;  %s433_s17 = scalar_lea.vmem %s2484_s12, %s1744_s27 }
 0x403   : > { %1516 = vperm.xlu0 %1633, %v1513_v13   ;;  %1371 = vperm.xlu1 %1634, %v1357_v18  }
 0x449   : > { %v690_v8 = vpop.permute.xlu0 %689  ;;  %v682_v17 = vpop.permute.xlu1 %681 }
 0x44a   : > { %v698_v57 = vsel %vm695_vm1, %v682_v17, %v690_v8  ;;  %v702_v7 = vsel %vm695_vm1, %v690_v8, %v682_v17 }
 0x44b   : > { %v719_v20 = vmul.f32 %v2019_v49, %v702_v7  ;;  %v720_v41 = vmul.f32 %v2021_v51, %v698_v57 }
 0x44d   : > { %v772_v4 = vpop.permute.xlu0 %771  ;;  %v764_v5 = vpop.permute.xlu1 %763  ;;  %v747_v56 = vmul.f32 %v736_v14, %v719_v20  ;;  %v748_v51 = vmul.f32 %v736_v14, %v720_v41 }
 0x44e   : > { %v778_v1 = vsel %vm775_vm2, %v764_v5, %v772_v4  ;;  %v782_v6 = vsel %vm775_vm2, %v772_v4, %v764_v5 }
 0x44f   : > { %v799_v35 = vmul.f32 %v2030_v38, %v782_v6  ;;  %v800_v54 = vmul.f32 %v2032_v33, %v778_v1 }
 0x451   : > { %v844_v47 = vpop.permute.xlu0 %843  ;;  %v827_v59 = vmul.f32 %v816_v37, %v799_v35  ;;  %v828_v12 = vmul.f32 %v816_v37, %v800_v54 }
 0x453   : > { %v835_v61 = vadd.f32 %v827_v59, %v747_v56  ;;  %v836_v25 = vadd.f32 %v828_v12, %v748_v51 }
 0x45e   : > { %v976_v11 = vpop.permute.xlu1 %975 }
 0x462   : > { %v852_v22 = vpop.permute.xlu1 %851  ;;  %v1012_v16 = vpop.permute.xlu0 %1011 }
 0x463   : > { %v858_v42 = vsel %vm855_vm3, %v844_v47, %v852_v22  ;;  %v862_v2 = vsel %vm855_vm3, %v852_v22, %v844_v47  ;;  %v1023_v5 = vmul.f32 %v1012_v16, %v2355_v23 }
 0x464   : > { %v879_v33 = vmul.f32 %v2519_v40, %v862_v2  ;;  %v880_v48 = vmul.f32 %v2520_v44, %v858_v42 }
 0x466   : > { %v924_v0 = vpop.permute.xlu1 %923  ;;  %v932_v63 = vpop.permute.xlu0 %931  ;;  %v907_v9 = vmul.f32 %v896_v34, %v879_v33  ;;  %v908_v52 = vmul.f32 %v896_v34, %v880_v48 }
 0x467   : > { %v938_v29 = vsel %vm935_vm4, %v924_v0, %v932_v63  ;;  %v942_v38 = vsel %vm935_vm4, %v932_v63, %v924_v0 }
 0x468   : > { %v959_v26 = vmul.f32 %v2046_v62, %v942_v38  ;;  %v960_v49 = vmul.f32 %v2048_v21, %v938_v29  ;;  %v915_v39 = vadd.f32 %v907_v9, %v835_v61  ;;  %v916_v62 = vadd.f32 %v908_v52, %v836_v25 }
 0x46a   : > { %v1092_v19 = vpop.permute.xlu1 %1091  ;;  %v1172_v53 = vpop.permute.xlu0 %1171  ;;  %v987_v55 = vmul.f32 %v976_v11, %v959_v26  ;;  %v988_v40 = vmul.f32 %v976_v11, %v960_v49 }
 0x46c   : > { %v995_v14 = vadd.f32 %v987_v55, %v915_v39  ;;  %v996_v34 = vadd.f32 %v988_v40, %v916_v62 }
 0x46e   : > { %v1040_v3 = vpop.permute.xlu1 %1039  ;;  %v1048_v15 = vpop.permute.xlu0 %1047  ;;  %v1031_v0 = vadd.f32 %v1023_v5, %v995_v14 }
 0x46f   : > { %v1054_v44 = vsel %vm1051_vm5, %v1040_v3, %v1048_v15  ;;  %v1058_v10 = vsel %vm1051_vm5, %v1048_v15, %v1040_v3 }
 0x470   : > { %v1075_v21 = vmul.f32 %v2050_v24, %v1054_v44  ;;  %v1076_v50 = vmul.f32 %v2052_v30, %v1058_v10  ;;  %v1024_v24 = vmul.f32 %v1012_v16, %v2357_v60 }
 0x472   : > { %v1252_v32 = vpop.permute.xlu1 %1251  ;;  %v1120_v58 = vpop.permute.xlu0 %1119  ;;  %v1103_v47 = vmul.f32 %v1092_v19, %v1075_v21  ;;  %v1104_v30 = vmul.f32 %v1092_v19, %v1076_v50  ;;  %v1032_v63 = vadd.f32 %v1024_v24, %v996_v34 }
 0x474   : > { %v1111_v7 = vadd.f32 %v1103_v47, %v1031_v0  ;;  %v1112_v60 = vadd.f32 %v1104_v30, %v1032_v63 }
 0x476   : > { %v1128_v18 = vpop.permute.xlu1 %1127  ;;  %v1332_v13 = vpop.permute.xlu0 %1331 }
 0x477   : > { %v1134_v37 = vsel %vm1131_vm6, %v1120_v58, %v1128_v18  ;;  %v1138_v8 = vsel %vm1131_vm6, %v1128_v18, %v1120_v58 }
 0x478   : > { %v1155_v17 = vmul.f32 %v2054_v31, %v1134_v37  ;;  %v1156_v4 = vmul.f32 %v2056_v46, %v1138_v8 }
 0x47a   : > { %v1200_v11 = vpop.permute.xlu1 %1199  ;;  %v1208_v22 = vpop.permute.xlu0 %1207  ;;  %v1183_v57 = vmul.f32 %v1172_v53, %v1155_v17  ;;  %v1184_v31 = vmul.f32 %v1172_v53, %v1156_v4 }
 0x47b   : > { %v1214_v1 = vsel %vm1211_vm7, %v1200_v11, %v1208_v22  ;;  %v1218_v6 = vsel %vm1211_vm7, %v1208_v22, %v1200_v11 }
 0x47c   : > { %v1235_v46 = vmul.f32 %v2058_v45, %v1214_v1  ;;  %v1236_v23 = vmul.f32 %v2060_v36, %v1218_v6  ;;  %v1191_v45 = vadd.f32 %v1183_v57, %v1111_v7  ;;  %v1192_v41 = vadd.f32 %v1184_v31, %v1112_v60 }
 0x47e   : > { %v1263_v16 = vmul.f32 %v1252_v32, %v1235_v46  ;;  %v1264_v35 = vmul.f32 %v1252_v32, %v1236_v23  ;;  %v1280_v54 = vpop.permute.xlu1 %1279  ;;  %v1288_v42 = vpop.permute.xlu0 %1287 }
 0x47f   : > { %v1294_v2 = vsel %vm1291_vm8, %v1280_v54, %v1288_v42  ;;  %v1298_v19 = vsel %vm1291_vm8, %v1288_v42, %v1280_v54 }
 0x480   : > { %v1315_v20 = vmul.f32 %v2511_v43, %v1294_v2  ;;  %v1316_v53 = vmul.f32 %v2512_v28, %v1298_v19  ;;  %v1271_v36 = vadd.f32 %v1263_v16, %v1191_v45  ;;  %v1272_v29 = vadd.f32 %v1264_v35, %v1192_v41 }
 0x482   : > { %v1343_v38 = vmul.f32 %v1332_v13, %v1315_v20  ;;  %v1344_v33 = vmul.f32 %v1332_v13, %v1316_v53  ;;  %v1372_v12 = vpop.permute.xlu1 %1371  ;;  %v1517_v27 = vpop.permute.xlu0 %1516 }
 0x484   : > { %v1351_v48 = vadd.f32 %v1343_v38, %v1271_v36  ;;  %v1352_v59 = vadd.f32 %v1344_v33, %v1272_v29 }
 0x486   : > { %v1383_v3 = vadd.f32 %v1372_v12, %v1351_v48  ;;  %v1384_v15 = vadd.f32 %v1372_v12, %v1352_v59 }
 0x488   : > { %v1519_v26 = vmul.f32 %v1517_v27, %v1383_v3  ;;  %v1520_v43 = vmul.f32 %v1517_v27, %v1384_v15 }
 0x48a   : > { %1521 = vst [vmem:[%s433_s17] sm:$0xff] %v1519_v26  ;;  %1522 = vst [vmem:[%s433_s17 + $0x8] sm:$0xff] %v1520_v43 }
 0x48b PF: > { %s22_s21 = sadd.s32 1, %s1653_s21  }
 0x48c   : > { %p19_p4 = scmp.ge.s32.totalorder %s22_s21, 4  }
 0x48e   :  { %21 = sbr.rel (!%p19_p4) target bundleno = 1 (0x1), region = 101 }

</bundles_post_ra>
